<compile_context>
chip_gen: v6e
topology: v6e:2x2x1
jax: 0.10.0
libtpu: 0.0.40
codegen_flags: <defaults>
</compile_context>

<pallas_src>
import functools

import jax
import jax.numpy as jnp
from jax.experimental import pallas as pl
from jax.experimental.pallas import tpu as pltpu

EPS = 1e-3  # BatchNorm2d(eps=0.001)


def conv_stats_kernel(x1_ref, x2_ref, x3_ref, w_ref, y_ref, sum_ref, sumsq_ref):
    """cat + 1x1 conv (single K=768 matmul) + per-channel sum / sumsq accumulation."""
    n = pl.program_id(0)
    t = pl.program_id(1)

    @pl.when((n == 0) & (t == 0))
    def _():
        sum_ref[...] = jnp.zeros_like(sum_ref)
        sumsq_ref[...] = jnp.zeros_like(sumsq_ref)

    cdt = w_ref.dtype
    # Fused cat: stack the three channel slices along the sublane axis
    # (offsets 0, 384, 480 are all tile-aligned), then one full-depth matmul.
    xcat = jnp.concatenate(
        [x1_ref[0].astype(cdt), x2_ref[0].astype(cdt), x3_ref[0].astype(cdt)],
        axis=0)                                                  # (Cin, T)
    y = jnp.dot(w_ref[...], xcat, preferred_element_type=jnp.float32)  # (Cout, T)

    y_ref[0] = y
    sum_ref[...] += jnp.sum(y, axis=1, keepdims=True)
    sumsq_ref[...] += jnp.sum(y * y, axis=1, keepdims=True)


def bn_relu_kernel(y_ref, sum_ref, sumsq_ref, gamma_ref, beta_ref, o_ref, *,
                   inv_count, eps):
    """Folded BatchNorm affine + ReLU: out = max(y*scale + shift, 0)."""
    mean = sum_ref[...] * inv_count                              # (Cout, 1)
    var = sumsq_ref[...] * inv_count - mean * mean
    var = jnp.maximum(var, 0.0)                                  # guard f32 cancellation
    scale = gamma_ref[...] * jax.lax.rsqrt(var + eps)
    shift = beta_ref[...] - mean * scale
    o_ref[0] = jnp.maximum(y_ref[0] * scale + shift, 0.0)


def fused_forward(x102, x111, x112, w, gamma, beta, *,
                  compute_dtype=jnp.bfloat16, eps=EPS):
    """x*: NCHW f32; w: (192, 768, 1, 1); gamma/beta: (192,). Returns NCHW f32."""
    N, c1, H, W = x102.shape
    c2, c3 = x111.shape[1], x112.shape[1]
    cout, cin = w.shape[0], w.shape[1]
    assert cin == c1 + c2 + c3

    hw = H * W
    count = N * hw

    # Pad the spatial (lane) axis to a multiple of 128 and pick a row tile.
    LANE = 128
    hwp = ((hw + LANE - 1) // LANE) * LANE
    tile = next(c for c in (512, 384, 256, 128) if hwp % c == 0)
    nt = hwp // tile

    def prep(x):
        xm = x.reshape(N, x.shape[1], hw)          # no transpose: 1x1 conv on NCHW
        if hwp != hw:
            xm = jnp.pad(xm, ((0, 0), (0, 0), (0, hwp - hw)))
        return xm

    x1m, x2m, x3m = prep(x102), prep(x111), prep(x112)
    wm = w[:, :, 0, 0].astype(compute_dtype)                     # (Cout, Cin)
    g = gamma.reshape(cout, 1).astype(jnp.float32)
    b = beta.reshape(cout, 1).astype(jnp.float32)

    const_spec = pl.BlockSpec((cout, 1), lambda n, t: (0, 0))

    # ---- Pass 1: conv output + per-channel sum / sumsq -------------------
    y, ysum, ysq = pl.pallas_call(
        conv_stats_kernel,
        grid=(N, nt),
        in_specs=[
            pl.BlockSpec((1, c1, tile), lambda n, t: (n, 0, t)),
            pl.BlockSpec((1, c2, tile), lambda n, t: (n, 0, t)),
            pl.BlockSpec((1, c3, tile), lambda n, t: (n, 0, t)),
            pl.BlockSpec((cout, cin), lambda n, t: (0, 0)),      # weight resident
        ],
        out_specs=(
            pl.BlockSpec((1, cout, tile), lambda n, t: (n, 0, t)),
            pl.BlockSpec((cout, 1), lambda n, t: (0, 0)),        # accumulator
            pl.BlockSpec((cout, 1), lambda n, t: (0, 0)),        # accumulator
        ),
        out_shape=(
            jax.ShapeDtypeStruct((N, cout, hwp), jnp.float32),
            jax.ShapeDtypeStruct((cout, 1), jnp.float32),
            jax.ShapeDtypeStruct((cout, 1), jnp.float32),
        ),
        compiler_params=pltpu.CompilerParams(
            dimension_semantics=("arbitrary", "arbitrary")),
    )(x1m, x2m, x3m, wm)

    # ---- Pass 2: normalize (folded affine) + ReLU ------------------------
    out_p = pl.pallas_call(
        functools.partial(bn_relu_kernel, inv_count=1.0 / count, eps=eps),
        grid=(N, nt),
        in_specs=[
            pl.BlockSpec((1, cout, tile), lambda n, t: (n, 0, t)),
            const_spec, const_spec, const_spec, const_spec,
        ],
        out_specs=pl.BlockSpec((1, cout, tile), lambda n, t: (n, 0, t)),
        out_shape=jax.ShapeDtypeStruct((N, cout, hwp), jnp.float32),
        compiler_params=pltpu.CompilerParams(
            dimension_semantics=("parallel", "parallel")),
    )(y, ysum, ysq, g, b)

    return out_p[:, :, :hw].reshape(N, cout, H, W)


def reference_forward(x102, x111, x112, w, gamma, beta):
    x = jnp.concatenate([x102, x111, x112], axis=1)
    y = jax.lax.conv_general_dilated(
        x, w, window_strides=(1, 1), padding="VALID",
        dimension_numbers=("NCHW", "OIHW", "NCHW"))
    mean = jnp.mean(y, axis=(0, 2, 3), keepdims=True)
    var = jnp.mean(jnp.square(y - mean), axis=(0, 2, 3), keepdims=True)
    yhat = (y - mean) * jax.lax.rsqrt(var + EPS)
    out = yhat * gamma.reshape(1, -1, 1, 1) + beta.reshape(1, -1, 1, 1)
    return jnp.maximum(out, 0.0)


if __name__ == "__main__":
    key = jax.random.PRNGKey(0)
    k1, k2, k3, kw, kg, kb = jax.random.split(key, 6)

    # Module's own (small) shapes: 384 + 96 + 288 = 768 input channels, 12x12 spatial.
    N, H, W = 1, 12, 12
    x102 = jax.random.normal(k1, (N, 384, H, W), dtype=jnp.float32)
    x111 = jax.random.normal(k2, (N, 96, H, W), dtype=jnp.float32)
    x112 = jax.random.normal(k3, (N, 288, H, W), dtype=jnp.float32)

    # Conv2d(768, 192, 1, bias=False) + BatchNorm2d(192) parameters.
    fan_in = 768
    w = jax.random.normal(kw, (192, 768, 1, 1), dtype=jnp.float32) * (2.0 / fan_in) ** 0.5
    gamma = 1.0 + 0.1 * jax.random.normal(kg, (192,), dtype=jnp.float32)
    beta = 0.1 * jax.random.normal(kb, (192,), dtype=jnp.float32)

    ref = jax.block_until_ready(reference_forward(x102, x111, x112, w, gamma, beta))

    # f32 matmul path (v5e-friendly): tight tolerance.
    out_f32 = jax.block_until_ready(
        fused_forward(x102, x111, x112, w, gamma, beta, compute_dtype=jnp.float32))
    assert out_f32.shape == (N, 192, H, W), out_f32.shape
    assert jnp.allclose(out_f32, ref, rtol=5e-3, atol=5e-3), \
        float(jnp.max(jnp.abs(out_f32 - ref)))

    # bf16 matmul path (v6e/v7x MXU peak), f32 accumulation: looser tolerance.
    out_bf16 = jax.block_until_ready(
        fused_forward(x102, x111, x112, w, gamma, beta, compute_dtype=jnp.bfloat16))
    assert out_bf16.shape == (N, 192, H, W), out_bf16.shape
    assert jnp.allclose(out_bf16, ref, rtol=3e-2, atol=3e-2), \
        float(jnp.max(jnp.abs(out_bf16 - ref)))

    print("KERNEL_OK")
</pallas_src>

<mosaic_0001>
module attributes {stable_mosaic.version = 11 : i64} {
  func.func @conv_stats_kernel(%arg0: i32, %arg1: i32, %arg2: memref<1x384x256xf32, #tpu.memory_space<vmem>>, %arg3: memref<1x96x256xf32, #tpu.memory_space<vmem>>, %arg4: memref<1x288x256xf32, #tpu.memory_space<vmem>>, %arg5: memref<192x768xf32, #tpu.memory_space<vmem>>, %arg6: memref<1x192x256xf32, #tpu.memory_space<vmem>>, %arg7: memref<192x1xf32, #tpu.memory_space<vmem>>, %arg8: memref<192x1xf32, #tpu.memory_space<vmem>>) attributes {dimension_semantics = [#tpu.dimension_semantics<arbitrary>, #tpu.dimension_semantics<arbitrary>], iteration_bounds = array<i64: 1, 1>, scalar_prefetch = 0 : i64, scratch_operands = 0 : i64, tpu.core_type = #tpu.core_type<tc>, window_params = [{transform_indices = @transform_0, window_bounds = array<i64: 1, 384, 256>}, {transform_indices = @transform_1, window_bounds = array<i64: 1, 96, 256>}, {transform_indices = @transform_2, window_bounds = array<i64: 1, 288, 256>}, {pipeline_mode = #tpu.pipeline_mode<synchronous>, transform_indices = @transform_3, window_bounds = array<i64: 192, 768>}, {transform_indices = @transform_4, window_bounds = array<i64: 1, 192, 256>}, {pipeline_mode = #tpu.pipeline_mode<synchronous>, transform_indices = @transform_5, window_bounds = array<i64: 192, 1>}, {pipeline_mode = #tpu.pipeline_mode<synchronous>, transform_indices = @transform_6, window_bounds = array<i64: 192, 1>}]} {
    %c0_i32 = arith.constant 0 : i32
    %0 = arith.cmpi eq, %arg0, %c0_i32 : i32
    %c0_i32_0 = arith.constant 0 : i32
    %1 = arith.cmpi eq, %arg1, %c0_i32_0 : i32
    %2 = arith.andi %0, %1 : i1
    %3 = arith.extui %2 : i1 to i32
    %c0_i32_1 = arith.constant 0 : i32
    %4 = arith.cmpi ne, %3, %c0_i32_1 : i32
    scf.if %4 {
      %cst_25 = arith.constant 0.000000e+00 : f32
      %28 = vector.broadcast %cst_25 : f32 to vector<192x1xf32>
      %c0_26 = arith.constant 0 : index
      %c0_27 = arith.constant 0 : index
      %29 = vector.load %arg7[%c0_26, %c0_27] : memref<192x1xf32, #tpu.memory_space<vmem>>, vector<192x1xf32>
      tpu.vector_store %arg7[%c0_26, %c0_27], %28 {strides = array<i32>} : memref<192x1xf32, #tpu.memory_space<vmem>>, vector<192x1xf32>,
      %cst_28 = arith.constant 0.000000e+00 : f32
      %30 = vector.broadcast %cst_28 : f32 to vector<192x1xf32>
      %c0_29 = arith.constant 0 : index
      %c0_30 = arith.constant 0 : index
      %31 = vector.load %arg8[%c0_29, %c0_30] : memref<192x1xf32, #tpu.memory_space<vmem>>, vector<192x1xf32>
      tpu.vector_store %arg8[%c0_29, %c0_30], %30 {strides = array<i32>} : memref<192x1xf32, #tpu.memory_space<vmem>>, vector<192x1xf32>,
    } else {
    }
    %c0 = arith.constant 0 : index
    %c0_2 = arith.constant 0 : index
    %c0_3 = arith.constant 0 : index
    %5 = vector.load %arg2[%c0, %c0_2, %c0_3] : memref<1x384x256xf32, #tpu.memory_space<vmem>>, vector<1x384x256xf32>
    %6 = vector.shape_cast %5 : vector<1x384x256xf32> to vector<384x256xf32>
    %c0_4 = arith.constant 0 : index
    %c0_5 = arith.constant 0 : index
    %c0_6 = arith.constant 0 : index
    %7 = vector.load %arg3[%c0_4, %c0_5, %c0_6] : memref<1x96x256xf32, #tpu.memory_space<vmem>>, vector<1x96x256xf32>
    %8 = vector.shape_cast %7 : vector<1x96x256xf32> to vector<96x256xf32>
    %c0_7 = arith.constant 0 : index
    %c0_8 = arith.constant 0 : index
    %c0_9 = arith.constant 0 : index
    %9 = vector.load %arg4[%c0_7, %c0_8, %c0_9] : memref<1x288x256xf32, #tpu.memory_space<vmem>>, vector<1x288x256xf32>
    %10 = vector.shape_cast %9 : vector<1x288x256xf32> to vector<288x256xf32>
    %11 = tpu.concatenate %6, %8, %10 in 0 : vector<384x256xf32>, vector<96x256xf32>, vector<288x256xf32> -> vector<768x256xf32>
    %c0_10 = arith.constant 0 : index
    %c0_11 = arith.constant 0 : index
    %12 = vector.load %arg5[%c0_10, %c0_11] : memref<192x768xf32, #tpu.memory_space<vmem>>, vector<192x768xf32>
    %cst = arith.constant dense<0.000000e+00> : vector<192x256xf32>
    %13 = tpu.matmul %12, %11, %cst {dimension_numbers = #tpu.dot_dimension_numbers<[1], [0], [0], [1], [0, 0, 1, 1], [], []>} : vector<192x768xf32>, vector<768x256xf32>, vector<192x256xf32> -> vector<192x256xf32>
    %c0_12 = arith.constant 0 : index
    %c0_13 = arith.constant 0 : index
    %c0_14 = arith.constant 0 : index
    %14 = vector.load %arg6[%c0_12, %c0_13, %c0_14] : memref<1x192x256xf32, #tpu.memory_space<vmem>>, vector<1x192x256xf32>
    %15 = vector.shape_cast %14 : vector<1x192x256xf32> to vector<192x256xf32>
    %16 = vector.shape_cast %13 : vector<192x256xf32> to vector<1x192x256xf32>
    tpu.vector_store %arg6[%c0_12, %c0_13, %c0_14], %16 {strides = array<i32>} : memref<1x192x256xf32, #tpu.memory_space<vmem>>, vector<1x192x256xf32>,
    %c0_15 = arith.constant 0 : index
    %c0_16 = arith.constant 0 : index
    %17 = vector.load %arg7[%c0_15, %c0_16] : memref<192x1xf32, #tpu.memory_space<vmem>>, vector<192x1xf32>
    %cst_17 = arith.constant dense<0.000000e+00> : vector<192xf32>
    %18 = vector.multi_reduction <add>, %13, %cst_17 [1] : vector<192x256xf32> to vector<192xf32>
    %19 = vector.shape_cast %18 : vector<192xf32> to vector<192x1xf32>
    %20 = arith.addf %17, %19 : vector<192x1xf32>
    %c0_18 = arith.constant 0 : index
    %c0_19 = arith.constant 0 : index
    %21 = vector.load %arg7[%c0_18, %c0_19] : memref<192x1xf32, #tpu.memory_space<vmem>>, vector<192x1xf32>
    tpu.vector_store %arg7[%c0_18, %c0_19], %20 {strides = array<i32>} : memref<192x1xf32, #tpu.memory_space<vmem>>, vector<192x1xf32>,
    %c0_20 = arith.constant 0 : index
    %c0_21 = arith.constant 0 : index
    %22 = vector.load %arg8[%c0_20, %c0_21] : memref<192x1xf32, #tpu.memory_space<vmem>>, vector<192x1xf32>
    %23 = arith.mulf %13, %13 : vector<192x256xf32>
    %cst_22 = arith.constant dense<0.000000e+00> : vector<192xf32>
    %24 = vector.multi_reduction <add>, %23, %cst_22 [1] : vector<192x256xf32> to vector<192xf32>
    %25 = vector.shape_cast %24 : vector<192xf32> to vector<192x1xf32>
    %26 = arith.addf %22, %25 : vector<192x1xf32>
    %c0_23 = arith.constant 0 : index
    %c0_24 = arith.constant 0 : index
    %27 = vector.load %arg8[%c0_23, %c0_24] : memref<192x1xf32, #tpu.memory_space<vmem>>, vector<192x1xf32>
    tpu.vector_store %arg8[%c0_23, %c0_24], %26 {strides = array<i32>} : memref<192x1xf32, #tpu.memory_space<vmem>>, vector<192x1xf32>,
    return
  }
  func.func @transform_0(%arg0: i32, %arg1: i32) -> (i32, i32, i32) {
    %c0_i32 = arith.constant 0 : i32
    %c0_i32_0 = arith.constant 0 : i32
    return %arg0, %c0_i32, %arg1 : i32, i32, i32
  }
  func.func @transform_1(%arg0: i32, %arg1: i32) -> (i32, i32, i32) {
    %c0_i32 = arith.constant 0 : i32
    %c0_i32_0 = arith.constant 0 : i32
    return %arg0, %c0_i32, %arg1 : i32, i32, i32
  }
  func.func @transform_2(%arg0: i32, %arg1: i32) -> (i32, i32, i32) {
    %c0_i32 = arith.constant 0 : i32
    %c0_i32_0 = arith.constant 0 : i32
    return %arg0, %c0_i32, %arg1 : i32, i32, i32
  }
  func.func @transform_3(%arg0: i32, %arg1: i32) -> (i32, i32) {
    %c0_i32 = arith.constant 0 : i32
    %c0_i32_0 = arith.constant 0 : i32
    %c0_i32_1 = arith.constant 0 : i32
    return %c0_i32, %c0_i32_0 : i32, i32
  }
  func.func @transform_4(%arg0: i32, %arg1: i32) -> (i32, i32, i32) {
    %c0_i32 = arith.constant 0 : i32
    %c0_i32_0 = arith.constant 0 : i32
    return %arg0, %c0_i32, %arg1 : i32, i32, i32
  }
  func.func @transform_5(%arg0: i32, %arg1: i32) -> (i32, i32) {
    %c0_i32 = arith.constant 0 : i32
    %c0_i32_0 = arith.constant 0 : i32
    %c0_i32_1 = arith.constant 0 : i32
    return %c0_i32, %c0_i32_0 : i32, i32
  }
  func.func @transform_6(%arg0: i32, %arg1: i32) -> (i32, i32) {
    %c0_i32 = arith.constant 0 : i32
    %c0_i32_0 = arith.constant 0 : i32
    %c0_i32_1 = arith.constant 0 : i32
    return %c0_i32, %c0_i32_0 : i32, i32
  }
}

</mosaic_0001>

<bundles_post_ra>
// kernel: tpu_custom_call.1
= control target key start
LH: loop header
LB: loop body
LE: loop exit
PB: predicated region body
PF: predicated region fallthrough
CT: control target
= control target key end

     0   :  { %12 = vsyncpa [#allocation3], 0  ;;  %s2660_s0 = inlined_call_operand.hbm [shape: f32[1,384,256], index: 0, kind: input, shape index: {}]   ;;  %s2661_s1 = inlined_call_operand.hbm [shape: f32[1,96,256], index: 1, kind: input, shape index: {}]   ;;  %s2662_s2 = inlined_call_operand.hbm [shape: f32[1,288,256], index: 2, kind: input, shape index: {}]   ;;  %s2663_s3 = inlined_call_operand.hbm [shape: f32[192,768], index: 3, kind: input, shape index: {}]   ;;  %s2664_s4 = inlined_call_operand.hbm [shape: f32[1,192,256], index: 4, kind: output, shape index: {0}]   ;;  %s2665_s5 = inlined_call_operand.vmem [shape: f32[192,1], index: 5, kind: output, shape index: {1}]   ;;  %s2666_s6 = inlined_call_operand.vmem [shape: f32[192,1], index: 6, kind: output, shape index: {2}]  }
   0x1   :  { %13 = vsyncpa [#allocation6], 0 }
   0x2   :  { %14 = vsyncpa [#allocation9], 0 }
   0x3   :  { %15 = vsyncpa [#allocation4], 0  ;;  %s1688_s21 = smov [#allocation5]   ;;  %s1689_s23 = smov [#allocation2]  }
   0x4   :  { %s33_s22 = sshll.u32 %s1688_s21, 4  ;;  %s21_s24 = sshll.u32 %s1689_s23, 4  ;;  %s34_s22 = int_to_ptr.vmem [resolvable:$true] %s33_s22  ;;  %s22_s24 = int_to_ptr.vmem [resolvable:$true] %s21_s24 }
   0x5   :  { %s1588_s25 = scalar_lea.vmem %s34_s22, 3072  ;;  %p1593_p1 = scmp.lt.s32.totalorder %s34_s22, %s34_s22 }
   0x6   :  { %p1589_p0 = scmp.ne.s32.totalorder %s34_s22, %s1588_s25  ;;  %p1594_p2 = scmp.lt.s32.totalorder %s1588_s25, %s1588_s25 }
   0x8   :  { %p1595_p3 = por %p1594_p2, %p1593_p1 }
   0xa   :  { %p1596_p4 = pnand %p1595_p3, %p1589_p0 }
   0xc   :  { %1599 = shalt.err (!%p1596_p4)
}
   0xd   :  { %s1690_s26 = smov 256   ;;  %s1691_s27 = smov 16  }
   0xe   :  { %39 = dma.hbm_to_vmem [thread:$0]  %s2661_s1, 3072, %s34_s22, [#allocation6], %s1690_s26, %s1690_s26, %s1691_s27  }
   0xf   :  { %s1608_s30 = scalar_lea.vmem %s22_s24, 12288  ;;  %p1613_p6 = scmp.lt.s32.totalorder %s22_s24, %s22_s24 }
  0x10   :  { %p1609_p5 = scmp.ne.s32.totalorder %s22_s24, %s1608_s30  ;;  %p1614_p7 = scmp.lt.s32.totalorder %s1608_s30, %s1608_s30 }
  0x12   :  { %p1615_p8 = por %p1614_p7, %p1613_p6 }
  0x14   :  { %p1616_p9 = pnand %p1615_p8, %p1609_p5 }
  0x16   :  { %1619 = shalt.err (!%p1616_p9)
}
  0x17   :  { %27 = dma.hbm_to_vmem [thread:$0]  %s2660_s0, 12288, %s22_s24, [#allocation3], %s1690_s26, %s1690_s26, %s1691_s27  }
  0x18   :  { %s1692_s9 = smov [#allocation7]   ;;  %s1693_s11 = smov [#allocation8]  }
  0x19   :  { %s45_s10 = sshll.u32 %s1692_s9, 4  ;;  %s57_s12 = sshll.u32 %s1693_s11, 4  ;;  %s46_s10 = int_to_ptr.vmem [resolvable:$true] %s45_s10  ;;  %s58_s12 = int_to_ptr.vmem [resolvable:$true] %s57_s12 }
  0x1a   :  { %s1628_s1 = scalar_lea.vmem %s46_s10, 9216  ;;  %p1633_p11 = scmp.lt.s32.totalorder %s46_s10, %s46_s10 }
  0x1b   :  { %p1629_p10 = scmp.ne.s32.totalorder %s46_s10, %s1628_s1  ;;  %p1634_p12 = scmp.lt.s32.totalorder %s1628_s1, %s1628_s1 }
  0x1d   :  { %p1635_p13 = por %p1634_p12, %p1633_p11 }
  0x1f   :  { %p1636_p0 = pnand %p1635_p13, %p1629_p10 }
  0x21   :  { %1639 = shalt.err (!%p1636_p0)
}
  0x22   :  { %51 = dma.hbm_to_vmem [thread:$0]  %s2662_s2, 9216, %s46_s10, [#allocation6], %s1690_s26, %s1690_s26, %s1691_s27  }
  0x23   :  { %s1648_s0 = scalar_lea.vmem %s58_s12, 18432  ;;  %p1653_p2 = scmp.lt.s32.totalorder %s58_s12, %s58_s12 }
  0x24   :  { %p1649_p1 = scmp.ne.s32.totalorder %s58_s12, %s1648_s0  ;;  %p1654_p3 = scmp.lt.s32.totalorder %s1648_s0, %s1648_s0 }
  0x26   :  { %p1655_p4 = por %p1654_p3, %p1653_p2 }
  0x28   :  { %p1656_p5 = pnand %p1655_p4, %p1649_p1 }
  0x2a   :  { %1659 = shalt.err (!%p1656_p5)
}
  0x2b   :  { %s1694_s15 = smov 768   ;;  %s1695_s16 = smov 48  }
  0x2c   :  { %63 = dma.hbm_to_vmem [thread:$0]  %s2663_s3, 18432, %s58_s12, [#allocation9], %s1694_s15, %s1694_s15, %s1695_s16  }
  0x2d   :  { %1680 = dma.done.wait [#allocation3], 12288  }
  0x2e   :  { %1681 = vsyncadd [#allocation3], 4294955008 }
  0x2f   :  { %1682 = dma.done.wait [#allocation6], 12288  }
  0x30   :  { %1683 = vsyncadd [#allocation6], 4294955008 }
  0x31   :  { %1684 = dma.done.wait [#allocation9], 18432  }
  0x32   :  { %1685 = vsyncadd [#allocation9], 4294948864  ;;  %v162_v0 = vld [vmem:[#allocation2 + $0xf8] sm:$0xff]  ;;  %v161_v2 = vld [vmem:[#allocation2 + $0xf0] sm:$0xff]  ;;  %vm82_vm0 = vcmask 7168   ;;  %s1697_s1 = smov [#allocation10]  }
  0x33   :  { %v226_v1 = vld [vmem:[#allocation2 + $0x2f8] sm:$0xff]  ;;  %467 = vmatprep.subr.mxu0 %v162_v0  ;;  %v225_v3 = vld [vmem:[#allocation2 + $0x2f0] sm:$0xff]  ;;  %v160_v4 = vld [vmem:[#allocation2 + $0xe8] sm:$0xff]  ;;  %s1484_s13 = sshll.u32 %s1697_s1, 4  ;;  %s1485_s13 = int_to_ptr.vmem [resolvable:$true] %s1484_s13 }
  0x34   :  { %676 = vmatprep.subr.mxu1 %v226_v1  ;;  %v224_v5 = vld [vmem:[#allocation2 + $0x2e8] sm:$0xff]  ;;  %468 = vmatpush1.msra.mxu0 %v161_v2  ;;  %v159_v6 = vld [vmem:[#allocation2 + $0xe0] sm:$0xff]  ;;  %v158_v8 = vld [vmem:[#allocation2 + $0xd8] sm:$0xff]  ;;  %s1660_s14 = scalar_lea.vmem %s1485_s13, 6144  ;;  %p1665_p7 = scmp.lt.s32.totalorder %s1485_s13, %s1485_s13 }
  0x35   :  { %677 = vmatpush1.msra.mxu1 %v225_v3  ;;  %v223_v7 = vld [vmem:[#allocation2 + $0x2e0] sm:$0xff]  ;;  %469 = vmatprep.subr.mxu0 %v160_v4  ;;  %v222_v9 = vld [vmem:[#allocation2 + $0x2d8] sm:$0xff]  ;;  %v157_v10 = vld [vmem:[#allocation2 + $0xd0] sm:$0xff]  ;;  %p1661_p6 = scmp.ne.s32.totalorder %s1485_s13, %s1660_s14  ;;  %p1666_p8 = scmp.lt.s32.totalorder %s1660_s14, %s1660_s14 }
  0x36   :  { %678 = vmatprep.subr.mxu1 %v224_v5  ;;  %v221_v11 = vld [vmem:[#allocation2 + $0x2d0] sm:$0xff]  ;;  %470 = vmatpush1.msra.mxu0 %v159_v6  ;;  %v156_v12 = vld [vmem:[#allocation2 + $0xc8] sm:$0xff]  ;;  %v155_v14 = vld [vmem:[#allocation2 + $0xc0] sm:$0xff] }
  0x37   :  { %679 = vmatpush1.msra.mxu1 %v223_v7  ;;  %v220_v13 = vld [vmem:[#allocation2 + $0x2c8] sm:$0xff]  ;;  %471 = vmatprep.subr.mxu0 %v158_v8  ;;  %v219_v15 = vld [vmem:[#allocation2 + $0x2c0] sm:$0xff]  ;;  %v154_v16 = vld [vmem:[#allocation2 + $0xb8] sm:$0xff]  ;;  %p1667_p9 = por %p1666_p8, %p1665_p7 }
  0x38   :  { %680 = vmatprep.subr.mxu1 %v222_v9  ;;  %472 = vmatpush1.msra.mxu0 %v157_v10  ;;  %v218_v17 = vld [vmem:[#allocation2 + $0x2b8] sm:$0xff]  ;;  %v153_v18 = vld [vmem:[#allocation2 + $0xb0] sm:$0xff]  ;;  %v152_v20 = vld [vmem:[#allocation2 + $0xa8] sm:$0xff] }
  0x39   :  { %681 = vmatpush1.msra.mxu1 %v221_v11  ;;  %473 = vmatprep.subr.mxu0 %v156_v12  ;;  %v217_v19 = vld [vmem:[#allocation2 + $0x2b0] sm:$0xff]  ;;  %v216_v21 = vld [vmem:[#allocation2 + $0x2a8] sm:$0xff]  ;;  %v151_v22 = vld [vmem:[#allocation2 + $0xa0] sm:$0xff]  ;;  %p1668_p10 = pnand %p1667_p9, %p1661_p6 }
  0x3a   :  { %682 = vmatprep.subr.mxu1 %v220_v13  ;;  %474 = vmatpush1.msra.mxu0 %v155_v14  ;;  %v215_v23 = vld [vmem:[#allocation2 + $0x2a0] sm:$0xff]  ;;  %v150_v24 = vld [vmem:[#allocation2 + $0x98] sm:$0xff]  ;;  %v149_v26 = vld [vmem:[#allocation2 + $0x90] sm:$0xff] }
  0x3b   :  { %683 = vmatpush1.msra.mxu1 %v219_v15  ;;  %475 = vmatprep.subr.mxu0 %v154_v16  ;;  %v214_v25 = vld [vmem:[#allocation2 + $0x298] sm:$0xff]  ;;  %v213_v27 = vld [vmem:[#allocation2 + $0x290] sm:$0xff]  ;;  %v148_v28 = vld [vmem:[#allocation2 + $0x88] sm:$0xff] }
  0x3c   :  { %684 = vmatprep.subr.mxu1 %v218_v17  ;;  %476 = vmatpush1.msra.mxu0 %v153_v18  ;;  %v212_v29 = vld [vmem:[#allocation2 + $0x288] sm:$0xff]  ;;  %v147_v30 = vld [vmem:[#allocation2 + $0x80] sm:$0xff]  ;;  %v146_v32 = vld [vmem:[#allocation2 + $0x78] sm:$0xff] }
  0x3d   :  { %685 = vmatpush1.msra.mxu1 %v217_v19  ;;  %477 = vmatprep.subr.mxu0 %v152_v20  ;;  %v211_v31 = vld [vmem:[#allocation2 + $0x280] sm:$0xff]  ;;  %v210_v33 = vld [vmem:[#allocation2 + $0x278] sm:$0xff]  ;;  %v145_v34 = vld [vmem:[#allocation2 + $0x70] sm:$0xff] }
  0x3e   :  { %686 = vmatprep.subr.mxu1 %v216_v21  ;;  %478 = vmatpush1.msra.mxu0 %v151_v22  ;;  %v209_v35 = vld [vmem:[#allocation2 + $0x270] sm:$0xff]  ;;  %v144_v36 = vld [vmem:[#allocation2 + $0x68] sm:$0xff]  ;;  %v143_v38 = vld [vmem:[#allocation2 + $0x60] sm:$0xff] }
  0x3f   :  { %687 = vmatpush1.msra.mxu1 %v215_v23  ;;  %479 = vmatprep.subr.mxu0 %v150_v24  ;;  %v208_v37 = vld [vmem:[#allocation2 + $0x268] sm:$0xff]  ;;  %v207_v39 = vld [vmem:[#allocation2 + $0x260] sm:$0xff]  ;;  %v142_v40 = vld [vmem:[#allocation2 + $0x58] sm:$0xff] }
  0x40   :  { %688 = vmatprep.subr.mxu1 %v214_v25  ;;  %480 = vmatpush1.msra.mxu0 %v149_v26  ;;  %v206_v41 = vld [vmem:[#allocation2 + $0x258] sm:$0xff]  ;;  %v141_v42 = vld [vmem:[#allocation2 + $0x50] sm:$0xff]  ;;  %v140_v44 = vld [vmem:[#allocation2 + $0x48] sm:$0xff] }
  0x41   :  { %689 = vmatpush1.msra.mxu1 %v213_v27  ;;  %481 = vmatprep.subr.mxu0 %v148_v28  ;;  %v205_v43 = vld [vmem:[#allocation2 + $0x250] sm:$0xff]  ;;  %v204_v45 = vld [vmem:[#allocation2 + $0x248] sm:$0xff]  ;;  %v139_v46 = vld [vmem:[#allocation2 + $0x40] sm:$0xff] }
  0x42   :  { %690 = vmatprep.subr.mxu1 %v212_v29  ;;  %482 = vmatpush1.msra.mxu0 %v147_v30  ;;  %v203_v47 = vld [vmem:[#allocation2 + $0x240] sm:$0xff]  ;;  %v138_v48 = vld [vmem:[#allocation2 + $0x38] sm:$0xff]  ;;  %v137_v50 = vld [vmem:[#allocation2 + $0x30] sm:$0xff] }
  0x43   :  { %691 = vmatpush1.msra.mxu1 %v211_v31  ;;  %483 = vmatprep.subr.mxu0 %v146_v32  ;;  %v202_v49 = vld [vmem:[#allocation2 + $0x238] sm:$0xff]  ;;  %v201_v51 = vld [vmem:[#allocation2 + $0x230] sm:$0xff]  ;;  %v136_v52 = vld [vmem:[#allocation2 + $0x28] sm:$0xff] }
  0x44   :  { %692 = vmatprep.subr.mxu1 %v210_v33  ;;  %484 = vmatpush1.msra.mxu0 %v145_v34  ;;  %v200_v53 = vld [vmem:[#allocation2 + $0x228] sm:$0xff]  ;;  %v135_v54 = vld [vmem:[#allocation2 + $0x20] sm:$0xff]  ;;  %v134_v56 = vld [vmem:[#allocation2 + $0x18] sm:$0xff] }
  0x45   :  { %693 = vmatpush1.msra.mxu1 %v209_v35  ;;  %485 = vmatprep.subr.mxu0 %v144_v36  ;;  %v199_v55 = vld [vmem:[#allocation2 + $0x220] sm:$0xff]  ;;  %v198_v57 = vld [vmem:[#allocation2 + $0x218] sm:$0xff]  ;;  %v133_v58 = vld [vmem:[#allocation2 + $0x10] sm:$0xff] }
  0x46   :  { %694 = vmatprep.subr.mxu1 %v208_v37  ;;  %486 = vmatpush1.msra.mxu0 %v143_v38  ;;  %v197_v59 = vld [vmem:[#allocation2 + $0x210] sm:$0xff]  ;;  %v132_v60 = vld [vmem:[#allocation2 + $0x8] sm:$0xff]  ;;  %v131_v62 = vld [vmem:[#allocation2] sm:$0xff] }
  0x47   :  { %695 = vmatpush1.msra.mxu1 %v207_v39  ;;  %487 = vmatprep.subr.mxu0 %v142_v40  ;;  %v196_v61 = vld [vmem:[#allocation2 + $0x208] sm:$0xff]  ;;  %v195_v63 = vld [vmem:[#allocation2 + $0x200] sm:$0xff]  ;;  %v194_v0 = vld [vmem:[#allocation2 + $0x1f8] sm:$0xff] }
  0x48   :  { %696 = vmatprep.subr.mxu1 %v206_v41  ;;  %488 = vmatpush1.msra.mxu0 %v141_v42  ;;  %v258_v1 = vld [vmem:[#allocation7 + $0x38] sm:$0xff]  ;;  %v193_v2 = vld [vmem:[#allocation2 + $0x1f0] sm:$0xff]  ;;  %v192_v4 = vld [vmem:[#allocation2 + $0x1e8] sm:$0xff] }
  0x49   :  { %697 = vmatpush1.msra.mxu1 %v205_v43  ;;  %489 = vmatprep.subr.mxu0 %v140_v44  ;;  %v257_v3 = vld [vmem:[#allocation7 + $0x30] sm:$0xff]  ;;  %v256_v5 = vld [vmem:[#allocation7 + $0x28] sm:$0xff]  ;;  %v191_v6 = vld [vmem:[#allocation2 + $0x1e0] sm:$0xff] }
  0x4a   :  { %698 = vmatprep.subr.mxu1 %v204_v45  ;;  %490 = vmatpush1.msra.mxu0 %v139_v46  ;;  %v255_v7 = vld [vmem:[#allocation7 + $0x20] sm:$0xff]  ;;  %v190_v8 = vld [vmem:[#allocation2 + $0x1d8] sm:$0xff]  ;;  %v189_v10 = vld [vmem:[#allocation2 + $0x1d0] sm:$0xff] }
  0x4b   :  { %699 = vmatpush1.msra.mxu1 %v203_v47  ;;  %491 = vmatprep.subr.mxu0 %v138_v48  ;;  %v254_v9 = vld [vmem:[#allocation7 + $0x18] sm:$0xff]  ;;  %v253_v11 = vld [vmem:[#allocation7 + $0x10] sm:$0xff]  ;;  %v188_v12 = vld [vmem:[#allocation2 + $0x1c8] sm:$0xff] }
  0x4c   :  { %700 = vmatprep.subr.mxu1 %v202_v49  ;;  %492 = vmatpush1.msra.mxu0 %v137_v50  ;;  %v252_v13 = vld [vmem:[#allocation7 + $0x8] sm:$0xff]  ;;  %v187_v14 = vld [vmem:[#allocation2 + $0x1c0] sm:$0xff]  ;;  %v186_v16 = vld [vmem:[#allocation2 + $0x1b8] sm:$0xff] }
  0x4d   :  { %701 = vmatpush1.msra.mxu1 %v201_v51  ;;  %493 = vmatprep.subr.mxu0 %v136_v52  ;;  %v251_v15 = vld [vmem:[#allocation7] sm:$0xff]  ;;  %v250_v17 = vld [vmem:[#allocation5 + $0xb8] sm:$0xff]  ;;  %v185_v18 = vld [vmem:[#allocation2 + $0x1b0] sm:$0xff] }
  0x4e   :  { %702 = vmatprep.subr.mxu1 %v200_v53  ;;  %494 = vmatpush1.msra.mxu0 %v135_v54  ;;  %v249_v19 = vld [vmem:[#allocation5 + $0xb0] sm:$0xff]  ;;  %v184_v20 = vld [vmem:[#allocation2 + $0x1a8] sm:$0xff]  ;;  %v183_v22 = vld [vmem:[#allocation2 + $0x1a0] sm:$0xff] }
  0x4f   :  { %703 = vmatpush1.msra.mxu1 %v199_v55  ;;  %495 = vmatprep.subr.mxu0 %v134_v56  ;;  %v248_v21 = vld [vmem:[#allocation5 + $0xa8] sm:$0xff]  ;;  %v247_v23 = vld [vmem:[#allocation5 + $0xa0] sm:$0xff]  ;;  %v182_v24 = vld [vmem:[#allocation2 + $0x198] sm:$0xff] }
  0x50   :  { %704 = vmatprep.subr.mxu1 %v198_v57  ;;  %496 = vmatpush1.msra.mxu0 %v133_v58  ;;  %v246_v25 = vld [vmem:[#allocation5 + $0x98] sm:$0xff]  ;;  %v181_v26 = vld [vmem:[#allocation2 + $0x190] sm:$0xff]  ;;  %v180_v28 = vld [vmem:[#allocation2 + $0x188] sm:$0xff] }
  0x51   :  { %705 = vmatpush1.msra.mxu1 %v197_v59  ;;  %497 = vmatprep.subr.mxu0 %v132_v60  ;;  %v245_v27 = vld [vmem:[#allocation5 + $0x90] sm:$0xff]  ;;  %v244_v29 = vld [vmem:[#allocation5 + $0x88] sm:$0xff]  ;;  %v179_v30 = vld [vmem:[#allocation2 + $0x180] sm:$0xff] }
  0x52   :  { %706 = vmatprep.subr.mxu1 %v196_v61  ;;  %498 = vmatpush1.msra.mxu0 %v131_v62  ;;  %v243_v31 = vld [vmem:[#allocation5 + $0x80] sm:$0xff]  ;;  %v178_v32 = vld [vmem:[#allocation2 + $0x178] sm:$0xff]  ;;  %v177_v34 = vld [vmem:[#allocation2 + $0x170] sm:$0xff] }
  0x53   :  { %707 = vmatpush1.msra.mxu1 %v195_v63  ;;  %499 = vmatprep.subr.mxu0 %v194_v0  ;;  %v242_v33 = vld [vmem:[#allocation5 + $0x78] sm:$0xff]  ;;  %v241_v35 = vld [vmem:[#allocation5 + $0x70] sm:$0xff]  ;;  %v176_v36 = vld [vmem:[#allocation2 + $0x168] sm:$0xff] }
  0x54   :  { %708 = vmatprep.subr.mxu1 %v258_v1  ;;  %500 = vmatpush2.msra.mxu0 %v193_v2  ;;  %v240_v37 = vld [vmem:[#allocation5 + $0x68] sm:$0xff]  ;;  %v175_v38 = vld [vmem:[#allocation2 + $0x160] sm:$0xff]  ;;  %v174_v40 = vld [vmem:[#allocation2 + $0x158] sm:$0xff] }
  0x55   :  { %709 = vmatpush2.msra.mxu1 %v257_v3  ;;  %501 = vmatprep.subr.mxu0 %v192_v4  ;;  %v239_v39 = vld [vmem:[#allocation5 + $0x60] sm:$0xff]  ;;  %v238_v41 = vld [vmem:[#allocation5 + $0x58] sm:$0xff]  ;;  %v173_v42 = vld [vmem:[#allocation2 + $0x150] sm:$0xff] }
  0x56   :  { %710 = vmatprep.subr.mxu1 %v256_v5  ;;  %502 = vmatpush2.msra.mxu0 %v191_v6  ;;  %v237_v43 = vld [vmem:[#allocation5 + $0x50] sm:$0xff]  ;;  %v172_v44 = vld [vmem:[#allocation2 + $0x148] sm:$0xff]  ;;  %v171_v46 = vld [vmem:[#allocation2 + $0x140] sm:$0xff] }
  0x57   :  { %711 = vmatpush2.msra.mxu1 %v255_v7  ;;  %503 = vmatprep.subr.mxu0 %v190_v8  ;;  %v236_v45 = vld [vmem:[#allocation5 + $0x48] sm:$0xff]  ;;  %v235_v47 = vld [vmem:[#allocation5 + $0x40] sm:$0xff]  ;;  %v170_v48 = vld [vmem:[#allocation2 + $0x138] sm:$0xff] }
  0x58   :  { %712 = vmatprep.subr.mxu1 %v254_v9  ;;  %504 = vmatpush2.msra.mxu0 %v189_v10  ;;  %v234_v49 = vld [vmem:[#allocation5 + $0x38] sm:$0xff]  ;;  %v169_v50 = vld [vmem:[#allocation2 + $0x130] sm:$0xff]  ;;  %v168_v52 = vld [vmem:[#allocation2 + $0x128] sm:$0xff] }
  0x59   :  { %713 = vmatpush2.msra.mxu1 %v253_v11  ;;  %505 = vmatprep.subr.mxu0 %v188_v12  ;;  %v233_v51 = vld [vmem:[#allocation5 + $0x30] sm:$0xff]  ;;  %v232_v53 = vld [vmem:[#allocation5 + $0x28] sm:$0xff]  ;;  %v167_v54 = vld [vmem:[#allocation2 + $0x120] sm:$0xff] }
  0x5a   :  { %714 = vmatprep.subr.mxu1 %v252_v13  ;;  %506 = vmatpush2.msra.mxu0 %v187_v14  ;;  %v231_v55 = vld [vmem:[#allocation5 + $0x20] sm:$0xff]  ;;  %v166_v56 = vld [vmem:[#allocation2 + $0x118] sm:$0xff]  ;;  %v165_v58 = vld [vmem:[#allocation2 + $0x110] sm:$0xff] }
  0x5b   :  { %715 = vmatpush2.msra.mxu1 %v251_v15  ;;  %507 = vmatprep.subr.mxu0 %v186_v16  ;;  %v230_v57 = vld [vmem:[#allocation5 + $0x18] sm:$0xff]  ;;  %v229_v59 = vld [vmem:[#allocation5 + $0x10] sm:$0xff]  ;;  %v164_v60 = vld [vmem:[#allocation2 + $0x108] sm:$0xff] }
  0x5c   :  { %716 = vmatprep.subr.mxu1 %v250_v17  ;;  %508 = vmatpush2.msra.mxu0 %v185_v18  ;;  %v228_v61 = vld [vmem:[#allocation5 + $0x8] sm:$0xff]  ;;  %v163_v62 = vld [vmem:[#allocation2 + $0x100] sm:$0xff]  ;;  %v326_v1 = vld [vmem:[#allocation8 + $0x18] sm:$0xff] }
  0x5d   :  { %717 = vmatpush2.msra.mxu1 %v249_v19  ;;  %509 = vmatprep.subr.mxu0 %v184_v20  ;;  %v324_v63 = vld [vmem:[#allocation8 + $0x8] sm:$0xff]  ;;  %v227_v0 = vld [vmem:[#allocation5] sm:$0xff]  ;;  %v325_v3 = vld [vmem:[#allocation8 + $0x10] sm:$0xff] }
  0x5e   :  { %718 = vmatprep.subr.mxu1 %v248_v21  ;;  %510 = vmatpush2.msra.mxu0 %v183_v22  ;;  %v323_v2 = vld [vmem:[#allocation8] sm:$0xff]  ;;  %v290_v4 = vld [vmem:[#allocation7 + $0x138] sm:$0xff]  ;;  %v289_v5 = vld [vmem:[#allocation7 + $0x130] sm:$0xff] }
  0x5f   :  { %719 = vmatpush2.msra.mxu1 %v247_v23  ;;  %511 = vmatprep.subr.mxu0 %v182_v24  ;;  %v330_v6 = vld [vmem:[#allocation8 + $0x38] sm:$0xff]  ;;  %v332_v7 = vld [vmem:[#allocation8 + $0x48] sm:$0xff]  ;;  %v329_v9 = vld [vmem:[#allocation8 + $0x30] sm:$0xff] }
  0x60   :  { %720 = vmatprep.subr.mxu1 %v246_v25  ;;  %512 = vmatpush2.msra.mxu0 %v181_v26  ;;  %v288_v8 = vld [vmem:[#allocation7 + $0x128] sm:$0xff]  ;;  %v331_v10 = vld [vmem:[#allocation8 + $0x40] sm:$0xff]  ;;  %v286_v12 = vld [vmem:[#allocation7 + $0x118] sm:$0xff] }
  0x61   :  { %721 = vmatpush2.msra.mxu1 %v245_v27  ;;  %513 = vmatprep.subr.mxu0 %v180_v28  ;;  %v287_v11 = vld [vmem:[#allocation7 + $0x120] sm:$0xff]  ;;  %v336_v13 = vld [vmem:[#allocation8 + $0x68] sm:$0xff]  ;;  %v338_v14 = vld [vmem:[#allocation8 + $0x78] sm:$0xff] }
  0x62   :  { %722 = vmatprep.subr.mxu1 %v244_v29  ;;  %514 = vmatpush2.msra.mxu0 %v179_v30  ;;  %v285_v15 = vld [vmem:[#allocation7 + $0x110] sm:$0xff]  ;;  %v335_v16 = vld [vmem:[#allocation8 + $0x60] sm:$0xff]  ;;  %v284_v18 = vld [vmem:[#allocation7 + $0x108] sm:$0xff] }
  0x63   :  { %723 = vmatpush2.msra.mxu1 %v243_v31  ;;  %515 = vmatprep.subr.mxu0 %v178_v32  ;;  %v337_v17 = vld [vmem:[#allocation8 + $0x70] sm:$0xff]  ;;  %v283_v19 = vld [vmem:[#allocation7 + $0x100] sm:$0xff]  ;;  %v342_v20 = vld [vmem:[#allocation8 + $0x98] sm:$0xff] }
  0x64   :  { %724 = vmatprep.subr.mxu1 %v242_v33  ;;  %516 = vmatpush2.msra.mxu0 %v177_v34  ;;  %v344_v21 = vld [vmem:[#allocation8 + $0xa8] sm:$0xff]  ;;  %v341_v22 = vld [vmem:[#allocation8 + $0x90] sm:$0xff]  ;;  %v343_v23 = vld [vmem:[#allocation8 + $0xa0] sm:$0xff] }
  0x65   :  { %725 = vmatpush2.msra.mxu1 %v241_v35  ;;  %517 = vmatprep.subr.mxu0 %v176_v36  ;;  %v282_v24 = vld [vmem:[#allocation7 + $0xf8] sm:$0xff]  ;;  %v281_v25 = vld [vmem:[#allocation7 + $0xf0] sm:$0xff]  ;;  %v348_v26 = vld [vmem:[#allocation8 + $0xc8] sm:$0xff] }
  0x66   :  { %726 = vmatprep.subr.mxu1 %v240_v37  ;;  %518 = vmatpush2.msra.mxu0 %v175_v38  ;;  %v350_v27 = vld [vmem:[#allocation8 + $0xd8] sm:$0xff]  ;;  %v280_v28 = vld [vmem:[#allocation7 + $0xe8] sm:$0xff]  ;;  %v347_v29 = vld [vmem:[#allocation8 + $0xc0] sm:$0xff] }
  0x67   :  { %727 = vmatpush2.msra.mxu1 %v239_v39  ;;  %519 = vmatprep.subr.mxu0 %v174_v40  ;;  %v349_v30 = vld [vmem:[#allocation8 + $0xd0] sm:$0xff]  ;;  %v279_v31 = vld [vmem:[#allocation7 + $0xe0] sm:$0xff]  ;;  %v278_v32 = vld [vmem:[#allocation7 + $0xd8] sm:$0xff] }
  0x68   :  { %728 = vmatprep.subr.mxu1 %v238_v41  ;;  %520 = vmatpush2.msra.mxu0 %v173_v42  ;;  %v354_v33 = vld [vmem:[#allocation8 + $0xf8] sm:$0xff]  ;;  %v356_v34 = vld [vmem:[#allocation8 + $0x108] sm:$0xff]  ;;  %v277_v35 = vld [vmem:[#allocation7 + $0xd0] sm:$0xff] }
  0x69   :  { %729 = vmatpush2.msra.mxu1 %v237_v43  ;;  %521 = vmatprep.subr.mxu0 %v172_v44  ;;  %v353_v36 = vld [vmem:[#allocation8 + $0xf0] sm:$0xff]  ;;  %v355_v37 = vld [vmem:[#allocation8 + $0x100] sm:$0xff]  ;;  %v276_v38 = vld [vmem:[#allocation7 + $0xc8] sm:$0xff] }
  0x6a   :  { %730 = vmatprep.subr.mxu1 %v236_v45  ;;  %522 = vmatpush2.msra.mxu0 %v171_v46  ;;  %v275_v39 = vld [vmem:[#allocation7 + $0xc0] sm:$0xff]  ;;  %v360_v40 = vld [vmem:[#allocation8 + $0x128] sm:$0xff]  ;;  %v362_v41 = vld [vmem:[#allocation8 + $0x138] sm:$0xff] }
  0x6b   :  { %731 = vmatpush2.msra.mxu1 %v235_v47  ;;  %523 = vmatprep.subr.mxu0 %v170_v48  ;;  %v359_v42 = vld [vmem:[#allocation8 + $0x120] sm:$0xff]  ;;  %v361_v43 = vld [vmem:[#allocation8 + $0x130] sm:$0xff]  ;;  %v274_v44 = vld [vmem:[#allocation7 + $0xb8] sm:$0xff] }
  0x6c   :  { %732 = vmatprep.subr.mxu1 %v234_v49  ;;  %524 = vmatpush2.msra.mxu0 %v169_v50  ;;  %v273_v45 = vld [vmem:[#allocation7 + $0xb0] sm:$0xff]  ;;  %v366_v46 = vld [vmem:[#allocation8 + $0x158] sm:$0xff]  ;;  %v368_v47 = vld [vmem:[#allocation8 + $0x168] sm:$0xff] }
  0x6d   :  { %733 = vmatpush2.msra.mxu1 %v233_v51  ;;  %525 = vmatprep.subr.mxu0 %v168_v52  ;;  %v272_v48 = vld [vmem:[#allocation7 + $0xa8] sm:$0xff]  ;;  %v365_v49 = vld [vmem:[#allocation8 + $0x150] sm:$0xff]  ;;  %v367_v50 = vld [vmem:[#allocation8 + $0x160] sm:$0xff] }
  0x6e   :  { %734 = vmatprep.subr.mxu1 %v232_v53  ;;  %526 = vmatpush2.msra.mxu0 %v167_v54  ;;  %v271_v51 = vld [vmem:[#allocation7 + $0xa0] sm:$0xff]  ;;  %v270_v52 = vld [vmem:[#allocation7 + $0x98] sm:$0xff]  ;;  %v372_v53 = vld [vmem:[#allocation8 + $0x188] sm:$0xff] }
  0x6f   :  { %735 = vmatpush2.msra.mxu1 %v231_v55  ;;  %527 = vmatprep.subr.mxu0 %v166_v56  ;;  %v374_v54 = vld [vmem:[#allocation8 + $0x198] sm:$0xff]  ;;  %v269_v55 = vld [vmem:[#allocation7 + $0x90] sm:$0xff]  ;;  %v371_v56 = vld [vmem:[#allocation8 + $0x180] sm:$0xff] }
  0x70   :  { %736 = vmatprep.subr.mxu1 %v230_v57  ;;  %528 = vmatpush2.msra.mxu0 %v165_v58  ;;  %v373_v57 = vld [vmem:[#allocation8 + $0x190] sm:$0xff]  ;;  %v268_v58 = vld [vmem:[#allocation7 + $0x88] sm:$0xff] }
  0x71   :  { %737 = vmatpush2.msra.mxu1 %v229_v59  ;;  %529 = vmatprep.subr.mxu0 %v164_v60  ;;  %v267_v59 = vld [vmem:[#allocation7 + $0x80] sm:$0xff]  ;;  %v378_v60 = vld [vmem:[#allocation8 + $0x1b8] sm:$0xff] }
  0x72   :  { %738 = vmatprep.subr.mxu1 %v228_v61  ;;  %530 = vmatpush2.msra.mxu0 %v163_v62  ;;  %v380_v61 = vld [vmem:[#allocation8 + $0x1c8] sm:$0xff]  ;;  %v377_v62 = vld [vmem:[#allocation8 + $0x1b0] sm:$0xff] }
  0x73   :  { %531 = vmatprep.mubr.f32.mxu0 %v324_v63  ;;  %739 = vmatpush2.msra.mxu1 %v227_v0  ;;  %v379_v63 = vld [vmem:[#allocation8 + $0x1c0] sm:$0xff]  ;;  %v266_v0 = vld [vmem:[#allocation7 + $0x78] sm:$0xff] }
  0x74   :  { %740 = vmatprep.mubr.f32.mxu1 %v326_v1  ;;  %532 = vmatmul.mubr.f32.vlgmr.msra.gmra.mxu0 %v323_v2  ;;  %v265_v1 = vld [vmem:[#allocation7 + $0x70] sm:$0xff]  ;;  %v384_v2 = vld [vmem:[#allocation8 + $0x1e8] sm:$0xff] }
  0x75   :  { %741 = vmatmul.mubr.f32.vlgmr.msra.gmra.mxu1 %v325_v3  ;;  %1506 = vmatprep.subr.mxu1 %v290_v4  ;;  %v386_v3 = vld [vmem:[#allocation8 + $0x1f8] sm:$0xff] }
  0x76   :  { %885 = vmatprep.subr.mxu0 %v290_v4  ;;  %1538 = vmatpush1.msra.mxu1 %v289_v5  ;;  %v264_v4 = vld [vmem:[#allocation7 + $0x68] sm:$0xff] }
  0x77   :  { %537 = vmatprep.mubr.f32.mxu0 %v330_v6  ;;  %746 = vmatprep.mubr.f32.mxu1 %v332_v7  ;;  %v385_v6 = vld [vmem:[#allocation8 + $0x1f0] sm:$0xff]  ;;  %v263_v7 = vld [vmem:[#allocation7 + $0x60] sm:$0xff] }
  0x78   :  { %886 = vmatpush1.msra.mxu0 %v289_v5  ;;  %1507 = vmatprep.subr.mxu1 %v288_v8  ;;  %v383_v5 = vld [vmem:[#allocation8 + $0x1e0] sm:$0xff] }
  0x79   :  { %538 = vmatmul.mubr.f32.gmra.mxu0 %v329_v9  ;;  %747 = vmatmul.mubr.f32.gmra.mxu1 %v331_v10  ;;  %v390_v9 = vld [vmem:[#allocation8 + $0x218] sm:$0xff]  ;;  %v392_v10 = vld [vmem:[#allocation8 + $0x228] sm:$0xff] }
  0x7a   :  { %887 = vmatprep.subr.mxu0 %v288_v8  ;;  %1539 = vmatpush1.msra.mxu1 %v287_v11  ;;  %v262_v8 = vld [vmem:[#allocation7 + $0x58] sm:$0xff] }
  0x7b   :  { %888 = vmatpush1.msra.mxu0 %v287_v11  ;;  %1508 = vmatprep.subr.mxu1 %v286_v12  ;;  %v261_v11 = vld [vmem:[#allocation7 + $0x50] sm:$0xff] }
  0x7c   :  { %543 = vmatprep.mubr.f32.mxu0 %v336_v13  ;;  %752 = vmatprep.mubr.f32.mxu1 %v338_v14  ;;  %v391_v13 = vld [vmem:[#allocation8 + $0x220] sm:$0xff]  ;;  %v260_v14 = vld [vmem:[#allocation7 + $0x48] sm:$0xff] }
  0x7d   :  { %1540 = vmatpush1.msra.mxu1 %v285_v15  ;;  %544 = vmatmul.mubr.f32.gmra.mxu0 %v335_v16  ;;  %v396_v16 = vld [vmem:[#allocation8 + $0x248] sm:$0xff] }
  0x7e   :  { %753 = vmatmul.mubr.f32.gmra.mxu1 %v337_v17  ;;  %889 = vmatprep.subr.mxu0 %v286_v12  ;;  %v389_v12 = vld [vmem:[#allocation8 + $0x210] sm:$0xff]  ;;  %v398_v17 = vld [vmem:[#allocation8 + $0x258] sm:$0xff] }
  0x7f   :  { %1509 = vmatprep.subr.mxu1 %v284_v18  ;;  %890 = vmatpush1.msra.mxu0 %v285_v15  ;;  %v259_v15 = vld [vmem:[#allocation7 + $0x40] sm:$0xff] }
  0x80   :  { %1541 = vmatpush1.msra.mxu1 %v283_v19  ;;  %549 = vmatprep.mubr.f32.mxu0 %v342_v20  ;;  %v322_v20 = vld [vmem:[#allocation7 + $0x238] sm:$0xff] }
  0x81   :  { %758 = vmatprep.mubr.f32.mxu1 %v344_v21  ;;  %891 = vmatprep.subr.mxu0 %v284_v18  ;;  %v395_v18 = vld [vmem:[#allocation8 + $0x240] sm:$0xff]  ;;  %v321_v21 = vld [vmem:[#allocation7 + $0x230] sm:$0xff] }
  0x82   :  { %550 = vmatmul.mubr.f32.gmra.mxu0 %v341_v22  ;;  %759 = vmatmul.mubr.f32.gmra.mxu1 %v343_v23  ;;  %v402_v22 = vld [vmem:[#allocation8 + $0x278] sm:$0xff]  ;;  %v404_v23 = vld [vmem:[#allocation8 + $0x288] sm:$0xff] }
  0x83   :  { %892 = vmatpush1.msra.mxu0 %v283_v19  ;;  %1510 = vmatprep.subr.mxu1 %v282_v24  ;;  %v397_v19 = vld [vmem:[#allocation8 + $0x250] sm:$0xff] }
  0x84   :  { %893 = vmatprep.subr.mxu0 %v282_v24  ;;  %1542 = vmatpush1.msra.mxu1 %v281_v25  ;;  %v320_v24 = vld [vmem:[#allocation7 + $0x228] sm:$0xff] }
  0x85   :  { %555 = vmatprep.mubr.f32.mxu0 %v348_v26  ;;  %764 = vmatprep.mubr.f32.mxu1 %v350_v27  ;;  %v403_v26 = vld [vmem:[#allocation8 + $0x280] sm:$0xff] }
  0x86   :  { %894 = vmatpush1.msra.mxu0 %v281_v25  ;;  %1511 = vmatprep.subr.mxu1 %v280_v28  ;;  %v401_v25 = vld [vmem:[#allocation8 + $0x270] sm:$0xff]  ;;  %v319_v27 = vld [vmem:[#allocation7 + $0x220] sm:$0xff] }
  0x87   :  { %556 = vmatmul.mubr.f32.gmra.mxu0 %v347_v29  ;;  %765 = vmatmul.mubr.f32.gmra.mxu1 %v349_v30  ;;  %v408_v29 = vld [vmem:[#allocation8 + $0x2a8] sm:$0xff]  ;;  %v410_v30 = vld [vmem:[#allocation8 + $0x2b8] sm:$0xff] }
  0x88   :  { %895 = vmatprep.subr.mxu0 %v280_v28  ;;  %1543 = vmatpush1.msra.mxu1 %v279_v31  ;;  %v318_v28 = vld [vmem:[#allocation7 + $0x218] sm:$0xff] }
  0x89   :  { %896 = vmatpush1.msra.mxu0 %v279_v31  ;;  %1512 = vmatprep.subr.mxu1 %v278_v32  ;;  %v317_v31 = vld [vmem:[#allocation7 + $0x210] sm:$0xff] }
  0x8a   :  { %561 = vmatprep.mubr.f32.mxu0 %v354_v33  ;;  %770 = vmatprep.mubr.f32.mxu1 %v356_v34  ;;  %v409_v33 = vld [vmem:[#allocation8 + $0x2b0] sm:$0xff]  ;;  %v316_v34 = vld [vmem:[#allocation7 + $0x208] sm:$0xff] }
  0x8b   :  { %1544 = vmatpush1.msra.mxu1 %v277_v35  ;;  %562 = vmatmul.mubr.f32.gmra.mxu0 %v353_v36  ;;  %v414_v36 = vld [vmem:[#allocation8 + $0x2d8] sm:$0xff] }
  0x8c   :  { %771 = vmatmul.mubr.f32.gmra.mxu1 %v355_v37  ;;  %897 = vmatprep.subr.mxu0 %v278_v32  ;;  %v407_v32 = vld [vmem:[#allocation8 + $0x2a0] sm:$0xff]  ;;  %v416_v37 = vld [vmem:[#allocation8 + $0x2e8] sm:$0xff] }
  0x8d   :  { %1513 = vmatprep.subr.mxu1 %v276_v38  ;;  %898 = vmatpush1.msra.mxu0 %v277_v35  ;;  %v315_v35 = vld [vmem:[#allocation7 + $0x200] sm:$0xff] }
  0x8e   :  { %1545 = vmatpush1.msra.mxu1 %v275_v39  ;;  %567 = vmatprep.mubr.f32.mxu0 %v360_v40  ;;  %v314_v40 = vld [vmem:[#allocation7 + $0x1f8] sm:$0xff] }
  0x8f   :  { %776 = vmatprep.mubr.f32.mxu1 %v362_v41  ;;  %899 = vmatprep.subr.mxu0 %v276_v38  ;;  %v413_v38 = vld [vmem:[#allocation8 + $0x2d0] sm:$0xff] }
  0x90   :  { %568 = vmatmul.mubr.f32.gmra.mxu0 %v359_v42  ;;  %777 = vmatmul.mubr.f32.gmra.mxu1 %v361_v43  ;;  %v313_v41 = vld [vmem:[#allocation7 + $0x1f0] sm:$0xff]  ;;  %v420_v42 = vld [vmem:[#allocation8 + $0x308] sm:$0xff]  ;;  %v422_v43 = vld [vmem:[#allocation8 + $0x318] sm:$0xff] }
  0x91   :  { %900 = vmatpush1.msra.mxu0 %v275_v39  ;;  %1514 = vmatprep.subr.mxu1 %v274_v44  ;;  %v415_v39 = vld [vmem:[#allocation8 + $0x2e0] sm:$0xff] }
  0x92   :  { %901 = vmatprep.subr.mxu0 %v274_v44  ;;  %1546 = vmatpush1.msra.mxu1 %v273_v45  ;;  %v312_v44 = vld [vmem:[#allocation7 + $0x1e8] sm:$0xff] }
  0x93   :  { %573 = vmatprep.mubr.f32.mxu0 %v366_v46  ;;  %782 = vmatprep.mubr.f32.mxu1 %v368_v47  ;;  %v421_v46 = vld [vmem:[#allocation8 + $0x310] sm:$0xff]  ;;  %v311_v47 = vld [vmem:[#allocation7 + $0x1e0] sm:$0xff] }
  0x94   :  { %902 = vmatpush1.msra.mxu0 %v273_v45  ;;  %1515 = vmatprep.subr.mxu1 %v272_v48  ;;  %v419_v45 = vld [vmem:[#allocation8 + $0x300] sm:$0xff] }
  0x95   :  { %574 = vmatmul.mubr.f32.gmra.mxu0 %v365_v49  ;;  %783 = vmatmul.mubr.f32.gmra.mxu1 %v367_v50  ;;  %v426_v49 = vld [vmem:[#allocation8 + $0x338] sm:$0xff]  ;;  %v428_v50 = vld [vmem:[#allocation8 + $0x348] sm:$0xff] }
  0x96   :  { %903 = vmatprep.subr.mxu0 %v272_v48  ;;  %1547 = vmatpush1.msra.mxu1 %v271_v51  ;;  %v310_v48 = vld [vmem:[#allocation7 + $0x1d8] sm:$0xff] }
  0x97   :  { %904 = vmatpush1.msra.mxu0 %v271_v51  ;;  %1516 = vmatprep.subr.mxu1 %v270_v52  ;;  %v309_v51 = vld [vmem:[#allocation7 + $0x1d0] sm:$0xff] }
  0x98   :  { %579 = vmatprep.mubr.f32.mxu0 %v372_v53  ;;  %788 = vmatprep.mubr.f32.mxu1 %v374_v54  ;;  %v427_v53 = vld [vmem:[#allocation8 + $0x340] sm:$0xff]  ;;  %v308_v54 = vld [vmem:[#allocation7 + $0x1c8] sm:$0xff] }
  0x99   :  { %1548 = vmatpush1.msra.mxu1 %v269_v55  ;;  %580 = vmatmul.mubr.f32.gmra.mxu0 %v371_v56  ;;  %v432_v56 = vld [vmem:[#allocation8 + $0x368] sm:$0xff] }
  0x9a   :  { %789 = vmatmul.mubr.f32.gmra.mxu1 %v373_v57  ;;  %905 = vmatprep.subr.mxu0 %v270_v52  ;;  %v425_v52 = vld [vmem:[#allocation8 + $0x330] sm:$0xff]  ;;  %v434_v57 = vld [vmem:[#allocation8 + $0x378] sm:$0xff] }
  0x9b   :  { %1517 = vmatprep.subr.mxu1 %v268_v58  ;;  %906 = vmatpush1.msra.mxu0 %v269_v55  ;;  %v307_v55 = vld [vmem:[#allocation7 + $0x1c0] sm:$0xff] }
  0x9c   :  { %1549 = vmatpush1.msra.mxu1 %v267_v59  ;;  %585 = vmatprep.mubr.f32.mxu0 %v378_v60  ;;  %v306_v60 = vld [vmem:[#allocation7 + $0x1b8] sm:$0xff] }
  0x9d   :  { %794 = vmatprep.mubr.f32.mxu1 %v380_v61  ;;  %907 = vmatprep.subr.mxu0 %v268_v58  ;;  %v431_v58 = vld [vmem:[#allocation8 + $0x360] sm:$0xff]  ;;  %v305_v61 = vld [vmem:[#allocation7 + $0x1b0] sm:$0xff] }
  0x9e   :  { %586 = vmatmul.mubr.f32.gmra.mxu0 %v377_v62  ;;  %795 = vmatmul.mubr.f32.gmra.mxu1 %v379_v63  ;;  %v438_v62 = vld [vmem:[#allocation8 + $0x398] sm:$0xff]  ;;  %v440_v63 = vld [vmem:[#allocation8 + $0x3a8] sm:$0xff] }
  0x9f   :  { %908 = vmatpush1.msra.mxu0 %v267_v59  ;;  %1518 = vmatprep.subr.mxu1 %v266_v0  ;;  %v433_v59 = vld [vmem:[#allocation8 + $0x370] sm:$0xff] }
  0xa0   :  { %909 = vmatprep.subr.mxu0 %v266_v0  ;;  %1550 = vmatpush1.msra.mxu1 %v265_v1  ;;  %v304_v0 = vld [vmem:[#allocation7 + $0x1a8] sm:$0xff] }
  0xa1   :  { %591 = vmatprep.mubr.f32.mxu0 %v384_v2  ;;  %800 = vmatprep.mubr.f32.mxu1 %v386_v3  ;;  %v439_v2 = vld [vmem:[#allocation8 + $0x3a0] sm:$0xff] }
  0xa2   :  { %910 = vmatpush1.msra.mxu0 %v265_v1  ;;  %1519 = vmatprep.subr.mxu1 %v264_v4  ;;  %v437_v1 = vld [vmem:[#allocation8 + $0x390] sm:$0xff]  ;;  %v303_v3 = vld [vmem:[#allocation7 + $0x1a0] sm:$0xff] }
  0xa3   :  { %592 = vmatmul.mubr.f32.gmra.mxu0 %v383_v5  ;;  %801 = vmatmul.mubr.f32.gmra.mxu1 %v385_v6  ;;  %v444_v5 = vld [vmem:[#allocation8 + $0x3c8] sm:$0xff]  ;;  %v446_v6 = vld [vmem:[#allocation8 + $0x3d8] sm:$0xff] }
  0xa4   :  { %911 = vmatprep.subr.mxu0 %v264_v4  ;;  %1551 = vmatpush1.msra.mxu1 %v263_v7  ;;  %v302_v4 = vld [vmem:[#allocation7 + $0x198] sm:$0xff] }
  0xa5   :  { %912 = vmatpush1.msra.mxu0 %v263_v7  ;;  %1520 = vmatprep.subr.mxu1 %v262_v8  ;;  %v301_v7 = vld [vmem:[#allocation7 + $0x190] sm:$0xff] }
  0xa6   :  { %597 = vmatprep.mubr.f32.mxu0 %v390_v9  ;;  %806 = vmatprep.mubr.f32.mxu1 %v392_v10  ;;  %v445_v9 = vld [vmem:[#allocation8 + $0x3d0] sm:$0xff]  ;;  %v300_v10 = vld [vmem:[#allocation7 + $0x188] sm:$0xff] }
  0xa7   :  { %1552 = vmatpush1.msra.mxu1 %v261_v11  ;;  %598 = vmatmul.mubr.f32.gmra.mxu0 %v389_v12  ;;  %v450_v12 = vld [vmem:[#allocation8 + $0x3f8] sm:$0xff] }
  0xa8   :  { %807 = vmatmul.mubr.f32.gmra.mxu1 %v391_v13  ;;  %913 = vmatprep.subr.mxu0 %v262_v8  ;;  %v443_v8 = vld [vmem:[#allocation8 + $0x3c0] sm:$0xff]  ;;  %v452_v13 = vld [vmem:[#allocation8 + $0x408] sm:$0xff] }
  0xa9   :  { %1521 = vmatprep.subr.mxu1 %v260_v14  ;;  %914 = vmatpush1.msra.mxu0 %v261_v11  ;;  %v299_v11 = vld [vmem:[#allocation7 + $0x180] sm:$0xff] }
  0xaa   :  { %1553 = vmatpush1.msra.mxu1 %v259_v15  ;;  %603 = vmatprep.mubr.f32.mxu0 %v396_v16  ;;  %v298_v16 = vld [vmem:[#allocation7 + $0x178] sm:$0xff] }
  0xab   :  { %812 = vmatprep.mubr.f32.mxu1 %v398_v17  ;;  %915 = vmatprep.subr.mxu0 %v260_v14  ;;  %v449_v14 = vld [vmem:[#allocation8 + $0x3f0] sm:$0xff] }
  0xac   :  { %604 = vmatmul.mubr.f32.gmra.mxu0 %v395_v18  ;;  %813 = vmatmul.mubr.f32.gmra.mxu1 %v397_v19  ;;  %v297_v17 = vld [vmem:[#allocation7 + $0x170] sm:$0xff]  ;;  %v456_v18 = vld [vmem:[#allocation8 + $0x428] sm:$0xff]  ;;  %v458_v19 = vld [vmem:[#allocation8 + $0x438] sm:$0xff] }
  0xad   :  { %916 = vmatpush1.msra.mxu0 %v259_v15  ;;  %1522 = vmatprep.subr.mxu1 %v322_v20  ;;  %v451_v15 = vld [vmem:[#allocation8 + $0x400] sm:$0xff] }
  0xae   :  { %917 = vmatprep.subr.mxu0 %v322_v20  ;;  %1554 = vmatpush2.msra.mxu1 %v321_v21  ;;  %v296_v20 = vld [vmem:[#allocation7 + $0x168] sm:$0xff] }
  0xaf   :  { %609 = vmatprep.mubr.f32.mxu0 %v402_v22  ;;  %818 = vmatprep.mubr.f32.mxu1 %v404_v23  ;;  %v457_v22 = vld [vmem:[#allocation8 + $0x430] sm:$0xff]  ;;  %v295_v23 = vld [vmem:[#allocation7 + $0x160] sm:$0xff] }
  0xb0   :  { %918 = vmatpush2.msra.mxu0 %v321_v21  ;;  %1523 = vmatprep.subr.mxu1 %v320_v24  ;;  %v455_v21 = vld [vmem:[#allocation8 + $0x420] sm:$0xff] }
  0xb1   :  { %610 = vmatmul.mubr.f32.gmra.mxu0 %v401_v25  ;;  %819 = vmatmul.mubr.f32.gmra.mxu1 %v403_v26  ;;  %v462_v25 = vld [vmem:[#allocation8 + $0x458] sm:$0xff]  ;;  %v464_v26 = vld [vmem:[#allocation8 + $0x468] sm:$0xff] }
  0xb2   :  { %919 = vmatprep.subr.mxu0 %v320_v24  ;;  %1555 = vmatpush2.msra.mxu1 %v319_v27  ;;  %v294_v24 = vld [vmem:[#allocation7 + $0x158] sm:$0xff] }
  0xb3   :  { %920 = vmatpush2.msra.mxu0 %v319_v27  ;;  %1524 = vmatprep.subr.mxu1 %v318_v28  ;;  %v293_v27 = vld [vmem:[#allocation7 + $0x150] sm:$0xff] }
  0xb4   :  { %615 = vmatprep.mubr.f32.mxu0 %v408_v29  ;;  %824 = vmatprep.mubr.f32.mxu1 %v410_v30  ;;  %v463_v29 = vld [vmem:[#allocation8 + $0x460] sm:$0xff]  ;;  %v292_v30 = vld [vmem:[#allocation7 + $0x148] sm:$0xff] }
  0xb5   :  { %1556 = vmatpush2.msra.mxu1 %v317_v31  ;;  %616 = vmatmul.mubr.f32.gmra.mxu0 %v407_v32  ;;  %v328_v32 = vld [vmem:[#allocation8 + $0x28] sm:$0xff] }
  0xb6   :  { %825 = vmatmul.mubr.f32.gmra.mxu1 %v409_v33  ;;  %921 = vmatprep.subr.mxu0 %v318_v28  ;;  %v461_v28 = vld [vmem:[#allocation8 + $0x450] sm:$0xff]  ;;  %v400_v33 = vld [vmem:[#allocation8 + $0x268] sm:$0xff] }
  0xb7   :  { %1525 = vmatprep.subr.mxu1 %v316_v34  ;;  %922 = vmatpush2.msra.mxu0 %v317_v31  ;;  %v291_v31 = vld [vmem:[#allocation7 + $0x140] sm:$0xff] }
  0xb8   :  { %1557 = vmatpush2.msra.mxu1 %v315_v35  ;;  %621 = vmatprep.mubr.f32.mxu0 %v414_v36  ;;  %v334_v36 = vld [vmem:[#allocation8 + $0x58] sm:$0xff] }
  0xb9   :  { %830 = vmatprep.mubr.f32.mxu1 %v416_v37  ;;  %923 = vmatprep.subr.mxu0 %v316_v34  ;;  %v327_v34 = vld [vmem:[#allocation8 + $0x20] sm:$0xff]  ;;  %v406_v37 = vld [vmem:[#allocation8 + $0x298] sm:$0xff] }
  0xba   :  { %622 = vmatmul.mubr.f32.gmra.mxu0 %v413_v38  ;;  %831 = vmatmul.mubr.f32.gmra.mxu1 %v415_v39  ;;  %v333_v38 = vld [vmem:[#allocation8 + $0x50] sm:$0xff] }
  0xbb   :  { %924 = vmatpush2.msra.mxu0 %v315_v35  ;;  %1526 = vmatprep.subr.mxu1 %v314_v40  ;;  %v399_v35 = vld [vmem:[#allocation8 + $0x260] sm:$0xff]  ;;  %v405_v39 = vld [vmem:[#allocation8 + $0x290] sm:$0xff] }
  0xbc   :  { %925 = vmatprep.subr.mxu0 %v314_v40  ;;  %1558 = vmatpush2.msra.mxu1 %v313_v41  ;;  %v340_v40 = vld [vmem:[#allocation8 + $0x88] sm:$0xff] }
  0xbd   :  { %627 = vmatprep.mubr.f32.mxu0 %v420_v42  ;;  %836 = vmatprep.mubr.f32.mxu1 %v422_v43  ;;  %v339_v42 = vld [vmem:[#allocation8 + $0x80] sm:$0xff] }
  0xbe   :  { %926 = vmatpush2.msra.mxu0 %v313_v41  ;;  %1527 = vmatprep.subr.mxu1 %v312_v44  ;;  %v412_v41 = vld [vmem:[#allocation8 + $0x2c8] sm:$0xff]  ;;  %v411_v43 = vld [vmem:[#allocation8 + $0x2c0] sm:$0xff] }
  0xbf   :  { %628 = vmatmul.mubr.f32.gmra.mxu0 %v419_v45  ;;  %837 = vmatmul.mubr.f32.gmra.mxu1 %v421_v46  ;;  %v418_v45 = vld [vmem:[#allocation8 + $0x2f8] sm:$0xff]  ;;  %v345_v46 = vld [vmem:[#allocation8 + $0xb0] sm:$0xff] }
  0xc0   :  { %927 = vmatprep.subr.mxu0 %v312_v44  ;;  %1559 = vmatpush2.msra.mxu1 %v311_v47  ;;  %v346_v44 = vld [vmem:[#allocation8 + $0xb8] sm:$0xff] }
  0xc1   :  { %928 = vmatpush2.msra.mxu0 %v311_v47  ;;  %1528 = vmatprep.subr.mxu1 %v310_v48  ;;  %v417_v47 = vld [vmem:[#allocation8 + $0x2f0] sm:$0xff] }
  0xc2   :  { %633 = vmatprep.mubr.f32.mxu0 %v426_v49  ;;  %842 = vmatprep.mubr.f32.mxu1 %v428_v50  ;;  %v424_v49 = vld [vmem:[#allocation8 + $0x328] sm:$0xff]  ;;  %v351_v50 = vld [vmem:[#allocation8 + $0xe0] sm:$0xff] }
  0xc3   :  { %1560 = vmatpush2.msra.mxu1 %v309_v51  ;;  %634 = vmatmul.mubr.f32.gmra.mxu0 %v425_v52  ;;  %v358_v52 = vld [vmem:[#allocation8 + $0x118] sm:$0xff] }
  0xc4   :  { %843 = vmatmul.mubr.f32.gmra.mxu1 %v427_v53  ;;  %929 = vmatprep.subr.mxu0 %v310_v48  ;;  %v352_v48 = vld [vmem:[#allocation8 + $0xe8] sm:$0xff]  ;;  %v430_v53 = vld [vmem:[#allocation8 + $0x358] sm:$0xff] }
  0xc5   :  { %1529 = vmatprep.subr.mxu1 %v308_v54  ;;  %930 = vmatpush2.msra.mxu0 %v309_v51  ;;  %v423_v51 = vld [vmem:[#allocation8 + $0x320] sm:$0xff] }
  0xc6   :  { %1561 = vmatpush2.msra.mxu1 %v307_v55  ;;  %639 = vmatprep.mubr.f32.mxu0 %v432_v56  ;;  %v364_v56 = vld [vmem:[#allocation8 + $0x148] sm:$0xff] }
  0xc7   :  { %848 = vmatprep.mubr.f32.mxu1 %v434_v57  ;;  %931 = vmatprep.subr.mxu0 %v308_v54  ;;  %v357_v54 = vld [vmem:[#allocation8 + $0x110] sm:$0xff]  ;;  %v436_v57 = vld [vmem:[#allocation8 + $0x388] sm:$0xff] }
  0xc8   :  { %640 = vmatmul.mubr.f32.gmra.mxu0 %v431_v58  ;;  %849 = vmatmul.mubr.f32.gmra.mxu1 %v433_v59  ;;  %v363_v58 = vld [vmem:[#allocation8 + $0x140] sm:$0xff] }
  0xc9   :  { %932 = vmatpush2.msra.mxu0 %v307_v55  ;;  %1530 = vmatprep.subr.mxu1 %v306_v60  ;;  %v429_v55 = vld [vmem:[#allocation8 + $0x350] sm:$0xff]  ;;  %v435_v59 = vld [vmem:[#allocation8 + $0x380] sm:$0xff] }
  0xca   :  { %933 = vmatprep.subr.mxu0 %v306_v60  ;;  %1562 = vmatpush2.msra.mxu1 %v305_v61  ;;  %v370_v60 = vld [vmem:[#allocation8 + $0x178] sm:$0xff] }
  0xcb   :  { %645 = vmatprep.mubr.f32.mxu0 %v438_v62  ;;  %854 = vmatprep.mubr.f32.mxu1 %v440_v63  ;;  %v369_v62 = vld [vmem:[#allocation8 + $0x170] sm:$0xff] }
  0xcc   :  { %934 = vmatpush2.msra.mxu0 %v305_v61  ;;  %1531 = vmatprep.subr.mxu1 %v304_v0  ;;  %v442_v61 = vld [vmem:[#allocation8 + $0x3b8] sm:$0xff]  ;;  %v441_v63 = vld [vmem:[#allocation8 + $0x3b0] sm:$0xff] }
  0xcd   :  { %646 = vmatmul.mubr.f32.gmra.mxu0 %v437_v1  ;;  %855 = vmatmul.mubr.f32.gmra.mxu1 %v439_v2  ;;  %v448_v1 = vld [vmem:[#allocation8 + $0x3e8] sm:$0xff]  ;;  %v375_v2 = vld [vmem:[#allocation8 + $0x1a0] sm:$0xff] }
  0xce   :  { %935 = vmatprep.subr.mxu0 %v304_v0  ;;  %1563 = vmatpush2.msra.mxu1 %v303_v3  ;;  %v376_v0 = vld [vmem:[#allocation8 + $0x1a8] sm:$0xff] }
  0xcf   :  { %936 = vmatpush2.msra.mxu0 %v303_v3  ;;  %1532 = vmatprep.subr.mxu1 %v302_v4  ;;  %v447_v3 = vld [vmem:[#allocation8 + $0x3e0] sm:$0xff] }
  0xd0   :  { %651 = vmatprep.mubr.f32.mxu0 %v444_v5  ;;  %860 = vmatprep.mubr.f32.mxu1 %v446_v6  ;;  %v454_v5 = vld [vmem:[#allocation8 + $0x418] sm:$0xff]  ;;  %v381_v6 = vld [vmem:[#allocation8 + $0x1d0] sm:$0xff] }
  0xd1   :  { %1564 = vmatpush2.msra.mxu1 %v301_v7  ;;  %652 = vmatmul.mubr.f32.gmra.mxu0 %v443_v8  ;;  %v388_v8 = vld [vmem:[#allocation8 + $0x208] sm:$0xff] }
  0xd2   :  { %861 = vmatmul.mubr.f32.gmra.mxu1 %v445_v9  ;;  %937 = vmatprep.subr.mxu0 %v302_v4  ;;  %v382_v4 = vld [vmem:[#allocation8 + $0x1d8] sm:$0xff]  ;;  %v460_v9 = vld [vmem:[#allocation8 + $0x448] sm:$0xff] }
  0xd3   :  { %1533 = vmatprep.subr.mxu1 %v300_v10  ;;  %938 = vmatpush2.msra.mxu0 %v301_v7  ;;  %v453_v7 = vld [vmem:[#allocation8 + $0x410] sm:$0xff] }
  0xd4   :  { %1565 = vmatpush2.msra.mxu1 %v299_v11  ;;  %657 = vmatprep.mubr.f32.mxu0 %v450_v12  ;;  %v394_v12 = vld [vmem:[#allocation8 + $0x238] sm:$0xff] }
  0xd5   :  { %866 = vmatprep.mubr.f32.mxu1 %v452_v13  ;;  %939 = vmatprep.subr.mxu0 %v300_v10  ;;  %v387_v10 = vld [vmem:[#allocation8 + $0x200] sm:$0xff]  ;;  %v466_v13 = vld [vmem:[#allocation8 + $0x478] sm:$0xff] }
  0xd6   :  { %658 = vmatmul.mubr.f32.gmra.mxu0 %v449_v14  ;;  %867 = vmatmul.mubr.f32.gmra.mxu1 %v451_v15  ;;  %v393_v14 = vld [vmem:[#allocation8 + $0x230] sm:$0xff] }
  0xd7   :  { %940 = vmatpush2.msra.mxu0 %v299_v11  ;;  %1534 = vmatprep.subr.mxu1 %v298_v16  ;;  %v459_v11 = vld [vmem:[#allocation8 + $0x440] sm:$0xff]  ;;  %v465_v15 = vld [vmem:[#allocation8 + $0x470] sm:$0xff] }
  0xd8   :  { %941 = vmatprep.subr.mxu0 %v298_v16  ;;  %1566 = vmatpush2.msra.mxu1 %v297_v17 }
  0xd9   :  { %663 = vmatprep.mubr.f32.mxu0 %v456_v18  ;;  %872 = vmatprep.mubr.f32.mxu1 %v458_v19 }
  0xda   :  { %942 = vmatpush2.msra.mxu0 %v297_v17  ;;  %1535 = vmatprep.subr.mxu1 %v296_v20 }
  0xdb   :  { %664 = vmatmul.mubr.f32.gmra.mxu0 %v455_v21  ;;  %873 = vmatmul.mubr.f32.gmra.mxu1 %v457_v22 }
  0xdc   :  { %943 = vmatprep.subr.mxu0 %v296_v20  ;;  %1567 = vmatpush2.msra.mxu1 %v295_v23 }
  0xdd   :  { %944 = vmatpush2.msra.mxu0 %v295_v23  ;;  %1536 = vmatprep.subr.mxu1 %v294_v24 }
  0xde   :  { %669 = vmatprep.mubr.f32.mxu0 %v462_v25  ;;  %878 = vmatprep.mubr.f32.mxu1 %v464_v26 }
  0xdf   :  { %1568 = vmatpush2.msra.mxu1 %v293_v27  ;;  %670 = vmatmul.mubr.f32.gmra.mxu0 %v461_v28 }
  0xe0   :  { %879 = vmatmul.mubr.f32.gmra.mxu1 %v463_v29  ;;  %945 = vmatprep.subr.mxu0 %v294_v24 }
  0xe1   :  { %1537 = vmatprep.subr.mxu1 %v292_v30  ;;  %946 = vmatpush2.msra.mxu0 %v293_v27 }
  0xe2   :  { %1569 = vmatpush2.msra.mxu1 %v291_v31  ;;  %947 = vmatprep.subr.mxu0 %v292_v30 }
  0xe3   :  { %949 = vmatprep.mubr.f32.mxu0 %v328_v32  ;;  %948 = vmatpush2.msra.mxu0 %v291_v31 }
  0xe4   :  { %1021 = vmatprep.mubr.f32.mxu1 %v400_v33  ;;  %950 = vmatmul.mubr.f32.vlgmr.msra.gmra.mxu0 %v327_v34 }
  0xe5   :  { %1022 = vmatmul.mubr.f32.vlgmr.msra.gmra.mxu1 %v399_v35  ;;  %955 = vmatprep.mubr.f32.mxu0 %v334_v36 }
  0xe6   :  { %1027 = vmatprep.mubr.f32.mxu1 %v406_v37 }
  0xe8   :  { %956 = vmatmul.mubr.f32.gmra.mxu0 %v333_v38 }
  0xe9   :  { %1028 = vmatmul.mubr.f32.gmra.mxu1 %v405_v39  ;;  %961 = vmatprep.mubr.f32.mxu0 %v340_v40 }
  0xea   :  { %1033 = vmatprep.mubr.f32.mxu1 %v412_v41 }
  0xec   :  { %962 = vmatmul.mubr.f32.gmra.mxu0 %v339_v42 }
  0xed   :  { %1034 = vmatmul.mubr.f32.gmra.mxu1 %v411_v43  ;;  %967 = vmatprep.mubr.f32.mxu0 %v346_v44 }
  0xee   :  { %1039 = vmatprep.mubr.f32.mxu1 %v418_v45 }
  0xf0   :  { %968 = vmatmul.mubr.f32.gmra.mxu0 %v345_v46 }
  0xf1   :  { %1040 = vmatmul.mubr.f32.gmra.mxu1 %v417_v47  ;;  %973 = vmatprep.mubr.f32.mxu0 %v352_v48 }
  0xf2   :  { %1045 = vmatprep.mubr.f32.mxu1 %v424_v49 }
  0xf4   :  { %974 = vmatmul.mubr.f32.gmra.mxu0 %v351_v50 }
  0xf5   :  { %1046 = vmatmul.mubr.f32.gmra.mxu1 %v423_v51  ;;  %979 = vmatprep.mubr.f32.mxu0 %v358_v52 }
  0xf6   :  { %1051 = vmatprep.mubr.f32.mxu1 %v430_v53 }
  0xf8   :  { %980 = vmatmul.mubr.f32.gmra.mxu0 %v357_v54 }
  0xf9   :  { %1052 = vmatmul.mubr.f32.gmra.mxu1 %v429_v55  ;;  %985 = vmatprep.mubr.f32.mxu0 %v364_v56 }
  0xfa   :  { %1057 = vmatprep.mubr.f32.mxu1 %v436_v57 }
  0xfc   :  { %986 = vmatmul.mubr.f32.gmra.mxu0 %v363_v58 }
  0xfd   :  { %1058 = vmatmul.mubr.f32.gmra.mxu1 %v435_v59  ;;  %991 = vmatprep.mubr.f32.mxu0 %v370_v60 }
  0xfe   :  { %1063 = vmatprep.mubr.f32.mxu1 %v442_v61 }
 0x100   :  { %992 = vmatmul.mubr.f32.gmra.mxu0 %v369_v62 }
 0x101   :  { %1064 = vmatmul.mubr.f32.gmra.mxu1 %v441_v63  ;;  %997 = vmatprep.mubr.f32.mxu0 %v376_v0 }
 0x102   :  { %1069 = vmatprep.mubr.f32.mxu1 %v448_v1 }
 0x104   :  { %998 = vmatmul.mubr.f32.gmra.mxu0 %v375_v2 }
 0x105   :  { %1070 = vmatmul.mubr.f32.gmra.mxu1 %v447_v3  ;;  %1003 = vmatprep.mubr.f32.mxu0 %v382_v4 }
 0x106   :  { %1075 = vmatprep.mubr.f32.mxu1 %v454_v5 }
 0x108   :  { %1004 = vmatmul.mubr.f32.gmra.mxu0 %v381_v6 }
 0x109   :  { %1076 = vmatmul.mubr.f32.gmra.mxu1 %v453_v7  ;;  %1009 = vmatprep.mubr.f32.mxu0 %v388_v8 }
 0x10a   :  { %1081 = vmatprep.mubr.f32.mxu1 %v460_v9 }
 0x10c   :  { %1010 = vmatmul.mubr.f32.gmra.mxu0 %v387_v10 }
 0x10d   :  { %1082 = vmatmul.mubr.f32.gmra.mxu1 %v459_v11  ;;  %1015 = vmatprep.mubr.f32.mxu0 %v394_v12 }
 0x10e   :  { %1087 = vmatprep.mubr.f32.mxu1 %v466_v13 }
 0x110   :  { %1016 = vmatmul.mubr.f32.gmra.mxu0 %v393_v14 }
 0x111   :  { %1088 = vmatmul.mubr.f32.gmra.mxu1 %v465_v15 }
 0x134   :  { %v533_v16 = vpop.f32.mrf.mxu0 }
 0x135   :  { %v742_v17 = vpop.f32.mrf.mxu1 }
 0x136   :  { %v1754_v18 = vadd.f32 %v742_v17, %v533_v16  ;;  %v535_v19 = vpop.f32.mrf.mxu0 }
 0x137   :  { %v744_v20 = vpop.f32.mrf.mxu1 }
 0x138   :  { %v1756_v21 = vadd.f32 %v744_v20, %v535_v19 }
 0x139   :  { %v539_v22 = vpop.f32.mrf.mxu0  ;;  %v748_v23 = vpop.f32.mrf.mxu1 }
 0x13a   :  { %v1758_v24 = vadd.f32 %v748_v23, %v539_v22 }
 0x13b   :  { %v541_v25 = vpop.f32.mrf.mxu0  ;;  %v750_v26 = vpop.f32.mrf.mxu1 }
 0x13c   :  { %v1760_v27 = vadd.f32 %v750_v26, %v541_v25 }
 0x13d   :  { %v545_v28 = vpop.f32.mrf.mxu0 }
 0x13e   :  { %v754_v29 = vpop.f32.mrf.mxu1 }
 0x13f   :  { %v1762_v30 = vadd.f32 %v754_v29, %v545_v28  ;;  %v547_v31 = vpop.f32.mrf.mxu0 }
 0x140   :  { %v756_v32 = vpop.f32.mrf.mxu1 }
 0x141   :  { %v1764_v33 = vadd.f32 %v756_v32, %v547_v31 }
 0x142   :  { %v551_v34 = vpop.f32.mrf.mxu0  ;;  %v760_v35 = vpop.f32.mrf.mxu1 }
 0x143   :  { %v1766_v36 = vadd.f32 %v760_v35, %v551_v34 }
 0x144   :  { %v553_v37 = vpop.f32.mrf.mxu0  ;;  %v762_v38 = vpop.f32.mrf.mxu1 }
 0x145   :  { %v1768_v39 = vadd.f32 %v762_v38, %v553_v37 }
 0x147   :  { %v557_v40 = vpop.f32.mrf.mxu0  ;;  %v766_v41 = vpop.f32.mrf.mxu1 }
 0x148   :  { %v1770_v42 = vadd.f32 %v766_v41, %v557_v40 }
 0x149   :  { %v559_v43 = vpop.f32.mrf.mxu0  ;;  %v768_v44 = vpop.f32.mrf.mxu1 }
 0x14a   :  { %v1772_v45 = vadd.f32 %v768_v44, %v559_v43 }
 0x14b   :  { %v563_v46 = vpop.f32.mrf.mxu0 }
 0x14c   :  { %v772_v47 = vpop.f32.mrf.mxu1 }
 0x14d   :  { %v1774_v48 = vadd.f32 %v772_v47, %v563_v46  ;;  %v565_v49 = vpop.f32.mrf.mxu0 }
 0x14e   :  { %v774_v50 = vpop.f32.mrf.mxu1 }
 0x14f   :  { %v1776_v51 = vadd.f32 %v774_v50, %v565_v49 }
 0x150   :  { %v569_v52 = vpop.f32.mrf.mxu0  ;;  %v778_v53 = vpop.f32.mrf.mxu1 }
 0x151   :  { %v1778_v54 = vadd.f32 %v778_v53, %v569_v52 }
 0x152   :  { %v571_v55 = vpop.f32.mrf.mxu0  ;;  %v780_v56 = vpop.f32.mrf.mxu1 }
 0x153   :  { %v1780_v57 = vadd.f32 %v780_v56, %v571_v55 }
 0x155   :  { %v575_v58 = vpop.f32.mrf.mxu0  ;;  %v784_v59 = vpop.f32.mrf.mxu1 }
 0x156   :  { %v1782_v60 = vadd.f32 %v784_v59, %v575_v58 }
 0x157   :  { %v577_v61 = vpop.f32.mrf.mxu0  ;;  %v786_v62 = vpop.f32.mrf.mxu1 }
 0x158   :  { %v1784_v63 = vadd.f32 %v786_v62, %v577_v61 }
 0x159   :  { %v581_v0 = vpop.f32.mrf.mxu0 }
 0x15a   :  { %v790_v1 = vpop.f32.mrf.mxu1 }
 0x15b   :  { %v1786_v2 = vadd.f32 %v790_v1, %v581_v0  ;;  %v583_v3 = vpop.f32.mrf.mxu0 }
 0x15c   :  { %v792_v4 = vpop.f32.mrf.mxu1 }
 0x15d   :  { %2667 = vst [vmem:[#allocation15_spill] sm:$0xff] %v1786_v2  ;;  %v1788_v5 = vadd.f32 %v792_v4, %v583_v3 }
 0x15e   :  { %v587_v6 = vpop.f32.mrf.mxu0  ;;  %v796_v7 = vpop.f32.mrf.mxu1 }
 0x15f   :  { %2668 = vst [vmem:[#allocation16_spill] sm:$0xff] %v1788_v5  ;;  %v1790_v8 = vadd.f32 %v796_v7, %v587_v6  ;;  %v1696_v7 = vmov 0.0  }
 0x160   :  { %v589_v9 = vpop.f32.mrf.mxu0  ;;  %v798_v10 = vpop.f32.mrf.mxu1  ;;  %83 = vst.msk [vmem:[%s2665_s5] sm:$0xff] %vm82_vm0, %v1696_v7  ;;  %84 = vst.msk [vmem:[%s2665_s5 + $0x8] sm:$0xff] %vm82_vm0, %v1696_v7 }
 0x161   :  { %2669 = vst [vmem:[#allocation17_spill] sm:$0xff] %v1790_v8  ;;  %v1792_v11 = vadd.f32 %v798_v10, %v589_v9  ;;  %85 = vst.msk [vmem:[%s2665_s5 + $0x10] sm:$0xff] %vm82_vm0, %v1696_v7 }
 0x162   :  { %86 = vst.msk [vmem:[%s2665_s5 + $0x18] sm:$0xff] %vm82_vm0, %v1696_v7  ;;  %87 = vst.msk [vmem:[%s2665_s5 + $0x20] sm:$0xff] %vm82_vm0, %v1696_v7 }
 0x163   :  { %2670 = vst [vmem:[#allocation18_spill] sm:$0xff] %v1792_v11  ;;  %v593_v12 = vpop.f32.mrf.mxu0  ;;  %v802_v13 = vpop.f32.mrf.mxu1  ;;  %88 = vst.msk [vmem:[%s2665_s5 + $0x28] sm:$0xff] %vm82_vm0, %v1696_v7 }
 0x164   :  { %v1794_v14 = vadd.f32 %v802_v13, %v593_v12  ;;  %89 = vst.msk [vmem:[%s2665_s5 + $0x30] sm:$0xff] %vm82_vm0, %v1696_v7  ;;  %90 = vst.msk [vmem:[%s2665_s5 + $0x38] sm:$0xff] %vm82_vm0, %v1696_v7 }
 0x165   :  { %v595_v15 = vpop.f32.mrf.mxu0  ;;  %v804_v16 = vpop.f32.mrf.mxu1  ;;  %91 = vst.msk [vmem:[%s2665_s5 + $0x40] sm:$0xff] %vm82_vm0, %v1696_v7  ;;  %92 = vst.msk [vmem:[%s2665_s5 + $0x48] sm:$0xff] %vm82_vm0, %v1696_v7 }
 0x166   :  { %2671 = vst [vmem:[#allocation19_spill] sm:$0xff] %v1794_v14  ;;  %v1796_v17 = vadd.f32 %v804_v16, %v595_v15  ;;  %93 = vst.msk [vmem:[%s2665_s5 + $0x50] sm:$0xff] %vm82_vm0, %v1696_v7 }
 0x167   :  { %v599_v19 = vpop.f32.mrf.mxu0  ;;  %94 = vst.msk [vmem:[%s2665_s5 + $0x58] sm:$0xff] %vm82_vm0, %v1696_v7  ;;  %95 = vst.msk [vmem:[%s2665_s5 + $0x60] sm:$0xff] %vm82_vm0, %v1696_v7 }
 0x168   :  { %2672 = vst [vmem:[#allocation20_spill] sm:$0xff] %v1796_v17  ;;  %v808_v20 = vpop.f32.mrf.mxu1  ;;  %96 = vst.msk [vmem:[%s2665_s5 + $0x68] sm:$0xff] %vm82_vm0, %v1696_v7 }
 0x169   :  { %v1798_v22 = vadd.f32 %v808_v20, %v599_v19  ;;  %v601_v23 = vpop.f32.mrf.mxu0  ;;  %97 = vst.msk [vmem:[%s2665_s5 + $0x70] sm:$0xff] %vm82_vm0, %v1696_v7  ;;  %98 = vst.msk [vmem:[%s2665_s5 + $0x78] sm:$0xff] %vm82_vm0, %v1696_v7 }
 0x16a   :  { %v810_v25 = vpop.f32.mrf.mxu1  ;;  %99 = vst.msk [vmem:[%s2665_s5 + $0x80] sm:$0xff] %vm82_vm0, %v1696_v7  ;;  %100 = vst.msk [vmem:[%s2665_s5 + $0x88] sm:$0xff] %vm82_vm0, %v1696_v7 }
 0x16b   :  { %2673 = vst [vmem:[#allocation21_spill] sm:$0xff] %v1798_v22  ;;  %v1800_v26 = vadd.f32 %v810_v25, %v601_v23  ;;  %101 = vst.msk [vmem:[%s2665_s5 + $0x90] sm:$0xff] %vm82_vm0, %v1696_v7 }
 0x16c   :  { %v1802_v28 = vpop.f32.mrf.mxu0  ;;  %v1804_v29 = vpop.f32.mrf.mxu1  ;;  %102 = vst.msk [vmem:[%s2665_s5 + $0x98] sm:$0xff] %vm82_vm0, %v1696_v7  ;;  %103 = vst.msk [vmem:[%s2665_s5 + $0xa0] sm:$0xff] %vm82_vm0, %v1696_v7 }
 0x16d   :  { %2674 = vst [vmem:[#allocation22_spill] sm:$0xff] %v1800_v26  ;;  %104 = vst.msk [vmem:[%s2665_s5 + $0xa8] sm:$0xff] %vm82_vm0, %v1696_v7 }
 0x16e   :  { %v1806_v31 = vpop.f32.mrf.mxu0  ;;  %v1808_v32 = vpop.f32.mrf.mxu1  ;;  %105 = vst.msk [vmem:[%s2665_s5 + $0xb0] sm:$0xff] %vm82_vm0, %v1696_v7  ;;  %106 = vst.msk [vmem:[%s2665_s5 + $0xb8] sm:$0xff] %vm82_vm0, %v1696_v7 }
 0x16f   :  { %107 = vst.msk [vmem:[%s2666_s6] sm:$0xff] %vm82_vm0, %v1696_v7  ;;  %108 = vst.msk [vmem:[%s2666_s6 + $0x8] sm:$0xff] %vm82_vm0, %v1696_v7 }
 0x170   :  { %109 = vst.msk [vmem:[%s2666_s6 + $0x10] sm:$0xff] %vm82_vm0, %v1696_v7  ;;  %110 = vst.msk [vmem:[%s2666_s6 + $0x18] sm:$0xff] %vm82_vm0, %v1696_v7 }
 0x171   :  { %v1810_v34 = vpop.f32.mrf.mxu0  ;;  %v1812_v35 = vpop.f32.mrf.mxu1  ;;  %111 = vst.msk [vmem:[%s2666_s6 + $0x20] sm:$0xff] %vm82_vm0, %v1696_v7  ;;  %112 = vst.msk [vmem:[%s2666_s6 + $0x28] sm:$0xff] %vm82_vm0, %v1696_v7 }
 0x172   :  { %113 = vst.msk [vmem:[%s2666_s6 + $0x30] sm:$0xff] %vm82_vm0, %v1696_v7  ;;  %114 = vst.msk [vmem:[%s2666_s6 + $0x38] sm:$0xff] %vm82_vm0, %v1696_v7 }
 0x173   :  { %v1814_v37 = vpop.f32.mrf.mxu0  ;;  %v1816_v38 = vpop.f32.mrf.mxu1  ;;  %115 = vst.msk [vmem:[%s2666_s6 + $0x40] sm:$0xff] %vm82_vm0, %v1696_v7  ;;  %116 = vst.msk [vmem:[%s2666_s6 + $0x48] sm:$0xff] %vm82_vm0, %v1696_v7 }
 0x174   :  { %117 = vst.msk [vmem:[%s2666_s6 + $0x50] sm:$0xff] %vm82_vm0, %v1696_v7  ;;  %118 = vst.msk [vmem:[%s2666_s6 + $0x58] sm:$0xff] %vm82_vm0, %v1696_v7 }
 0x175   :  { %v1818_v40 = vpop.f32.mrf.mxu0  ;;  %119 = vst.msk [vmem:[%s2666_s6 + $0x60] sm:$0xff] %vm82_vm0, %v1696_v7  ;;  %120 = vst.msk [vmem:[%s2666_s6 + $0x68] sm:$0xff] %vm82_vm0, %v1696_v7 }
 0x176   :  { %v1820_v41 = vpop.f32.mrf.mxu1  ;;  %121 = vst.msk [vmem:[%s2666_s6 + $0x70] sm:$0xff] %vm82_vm0, %v1696_v7  ;;  %122 = vst.msk [vmem:[%s2666_s6 + $0x78] sm:$0xff] %vm82_vm0, %v1696_v7 }
 0x177   :  { %v1822_v43 = vpop.f32.mrf.mxu0  ;;  %123 = vst.msk [vmem:[%s2666_s6 + $0x80] sm:$0xff] %vm82_vm0, %v1696_v7  ;;  %124 = vst.msk [vmem:[%s2666_s6 + $0x88] sm:$0xff] %vm82_vm0, %v1696_v7 }
 0x178   :  { %v1824_v44 = vpop.f32.mrf.mxu1  ;;  %125 = vst.msk [vmem:[%s2666_s6 + $0x90] sm:$0xff] %vm82_vm0, %v1696_v7  ;;  %126 = vst.msk [vmem:[%s2666_s6 + $0x98] sm:$0xff] %vm82_vm0, %v1696_v7 }
 0x179   :  { %127 = vst.msk [vmem:[%s2666_s6 + $0xa0] sm:$0xff] %vm82_vm0, %v1696_v7  ;;  %128 = vst.msk [vmem:[%s2666_s6 + $0xa8] sm:$0xff] %vm82_vm0, %v1696_v7 }
 0x17a   :  { %v1826_v46 = vpop.f32.mrf.mxu0  ;;  %v1828_v47 = vpop.f32.mrf.mxu1  ;;  %129 = vst.msk [vmem:[%s2666_s6 + $0xb0] sm:$0xff] %vm82_vm0, %v1696_v7  ;;  %130 = vst.msk [vmem:[%s2666_s6 + $0xb8] sm:$0xff] %vm82_vm0, %v1696_v7 }
 0x17c   :  { %v1830_v49 = vpop.f32.mrf.mxu0  ;;  %v1832_v50 = vpop.f32.mrf.mxu1 }
 0x17f   :  { %v1834_v52 = vpop.f32.mrf.mxu0  ;;  %v1836_v53 = vpop.f32.mrf.mxu1 }
 0x181   :  { %v1838_v55 = vpop.f32.mrf.mxu0  ;;  %v1840_v56 = vpop.f32.mrf.mxu1 }
 0x183   :  { %v1842_v58 = vpop.f32.mrf.mxu0 }
 0x184   :  { %v1844_v59 = vpop.f32.mrf.mxu1 }
 0x185   :  { %v1846_v61 = vpop.f32.mrf.mxu0 }
 0x186   :  { %v1848_v62 = vpop.f32.mrf.mxu1 }
 0x188   :  { %v1850_v0 = vpop.f32.mrf.mxu0  ;;  %v1852_v1 = vpop.f32.mrf.mxu1 }
 0x18a   :  { %v1854_v3 = vpop.f32.mrf.mxu0  ;;  %v1856_v4 = vpop.f32.mrf.mxu1 }
 0x18d   :  { %v1858_v6 = vpop.f32.mrf.mxu0  ;;  %v2052_v9 = vpop.f32.mrf.mxu1 }
 0x18f   :  { %v2054_v10 = vpop.f32.mrf.mxu0  ;;  %v2056_v12 = vpop.f32.mrf.mxu1 }
 0x191   :  { %v2058_v13 = vpop.f32.mrf.mxu0 }
 0x192   :  { %v2060_v15 = vpop.f32.mrf.mxu1 }
 0x193   :  { %v2062_v16 = vpop.f32.mrf.mxu0 }
 0x194   :  { %v2064_v19 = vpop.f32.mrf.mxu1 }
 0x196   :  { %v2066_v20 = vpop.f32.mrf.mxu0  ;;  %v2068_v23 = vpop.f32.mrf.mxu1 }
 0x197   :  { %2675 = vst [vmem:[#allocation23_spill] sm:$0xff] %v2066_v20  ;;  %2676 = vst [vmem:[#allocation24_spill] sm:$0xff] %v2068_v23 }
 0x198   :  { %v2070_v25 = vpop.f32.mrf.mxu0  ;;  %v2072_v7 = vpop.f32.mrf.mxu1 }
 0x199   :  { %2677 = vst [vmem:[#allocation25_spill] sm:$0xff] %v2070_v25  ;;  %2678 = vst [vmem:[#allocation26_spill] sm:$0xff] %v2072_v7  ;;  %v815_v25 = vadd.f32 %v1804_v29, %v1802_v28  ;;  %v823_v29 = vadd.f32 %v1816_v38, %v1814_v37 }
 0x19b   :  { %v2074_v26 = vpop.f32.mrf.mxu0  ;;  %v2076_v22 = vpop.f32.mrf.mxu1 }
 0x19c   :  { %2679 = vst [vmem:[#allocation27_spill] sm:$0xff] %v2074_v26  ;;  %2680 = vst [vmem:[#allocation28_spill] sm:$0xff] %v2076_v22  ;;  %v817_v22 = vadd.f32 %v1808_v32, %v1806_v31 }
 0x19d   :  { %v2078_v17 = vpop.f32.mrf.mxu0  ;;  %v2080_v14 = vpop.f32.mrf.mxu1 }
 0x19e   :  { %2681 = vst [vmem:[#allocation29_spill] sm:$0xff] %v2078_v17  ;;  %2682 = vst [vmem:[#allocation30_spill] sm:$0xff] %v2080_v14 }
 0x19f   :  { %v2082_v11 = vpop.f32.mrf.mxu0 }
 0x1a0   :  { %2683 = vst [vmem:[#allocation31_spill] sm:$0xff] %v2082_v11  ;;  %v2084_v8 = vpop.f32.mrf.mxu1 }
 0x1a1   :  { %2684 = vst [vmem:[#allocation32_spill] sm:$0xff] %v2084_v8  ;;  %v2086_v5 = vpop.f32.mrf.mxu0  ;;  %v821_v8 = vadd.f32 %v1812_v35, %v1810_v34  ;;  %v827_v35 = vadd.f32 %v1820_v41, %v1818_v40 }
 0x1a2   :  { %2685 = vst [vmem:[#allocation33_spill] sm:$0xff] %v2086_v5  ;;  %v2088_v20 = vpop.f32.mrf.mxu1 }
 0x1a3   :  { %2686 = vst [vmem:[#allocation34_spill] sm:$0xff] %v2088_v20 }
 0x1a4   :  { %v951_v7 = vpop.f32.mrf.mxu0 }
 0x1a5   :  { %v1023_v23 = vpop.f32.mrf.mxu1  ;;  %v952_v17 = vadd.f32 %v951_v7, %v1754_v18 }
 0x1a6   :  { %v1024_v26 = vadd.f32 %v1023_v23, %v815_v25  ;;  %v953_v14 = vpop.f32.mrf.mxu0 }
 0x1a7   :  { %v1025_v2 = vpop.f32.mrf.mxu1  ;;  %1094 = vst [vmem:[#allocation10] sm:$0xff] %v952_v17  ;;  %v954_v20 = vadd.f32 %v953_v14, %v1756_v21  ;;  %v1311_v7 = vmul.f32 %v952_v17, %v952_v17  ;;  %v829_v14 = vadd.f32 %v1824_v44, %v1822_v43 }
 0x1a8   :  { %1118 = vst [vmem:[#allocation10 + $0xc0] sm:$0xff] %v1024_v26  ;;  %v1026_v5 = vadd.f32 %v1025_v2, %v817_v22  ;;  %v957_v11 = vpop.f32.mrf.mxu0 }
 0x1a9   :  { %v1029_v28 = vpop.f32.mrf.mxu1  ;;  %1095 = vst [vmem:[#allocation10 + $0x8] sm:$0xff] %v954_v20  ;;  %v958_v18 = vadd.f32 %v957_v11, %v1758_v24  ;;  %v1166_v32 = vadd.f32 %v954_v20, %v952_v17  ;;  %v1312_v34 = vmul.f32 %v954_v20, %v954_v20 }
 0x1aa   :  { %1119 = vst [vmem:[#allocation10 + $0xc8] sm:$0xff] %v1026_v5  ;;  %v1030_v31 = vadd.f32 %v1029_v28, %v821_v8  ;;  %v959_v23 = vpop.f32.mrf.mxu0  ;;  %v1202_v8 = vadd.f32 %v1026_v5, %v1024_v26 }
 0x1ab   :  { %v1031_v25 = vpop.f32.mrf.mxu1  ;;  %1096 = vst [vmem:[#allocation10 + $0x10] sm:$0xff] %v958_v18  ;;  %v960_v21 = vadd.f32 %v959_v23, %v1760_v27  ;;  %1167 = vadd.xlane.f32.xlu0 %v1166_v32  ;;  %v1313_v11 = vmul.f32 %v958_v18, %v958_v18  ;;  %v1359_v37 = vadd.f32 %v1312_v34, %v1311_v7 }
 0x1ac   :  { %1120 = vst [vmem:[#allocation10 + $0xd0] sm:$0xff] %v1030_v31  ;;  %v1032_v2 = vadd.f32 %v1031_v25, %v823_v29  ;;  %v963_v22 = vpop.f32.mrf.mxu0  ;;  %v833_v27 = vadd.f32 %v1828_v47, %v1826_v46  ;;  %v835_v32 = vadd.f32 %v1832_v50, %v1830_v49  ;;  %v1336_v46 = vmul.f32 %v1026_v5, %v1026_v5 }
 0x1ad   :  { %v1035_v24 = vpop.f32.mrf.mxu1  ;;  %1097 = vst [vmem:[#allocation10 + $0x18] sm:$0xff] %v960_v21  ;;  %v964_v17 = vadd.f32 %v963_v22, %v1762_v30  ;;  %v1314_v41 = vmul.f32 %v960_v21, %v960_v21  ;;  %v2111_v29 = vadd.f32 %v960_v21, %v958_v18  ;;  %v839_v34 = vadd.f32 %v1836_v53, %v1834_v52 }
 0x1ae   :  { %1121 = vst [vmem:[#allocation10 + $0xd8] sm:$0xff] %v1032_v2  ;;  %v2107_v38 = vadd.f32 %v1035_v24, %v827_v35  ;;  %v1205_v40 = vadd.f32 %v1032_v2, %v1030_v31  ;;  %v965_v20 = vpop.f32.mrf.mxu0  ;;  %v1338_v7 = vmul.f32 %v1032_v2, %v1032_v2  ;;  %v841_v2 = vadd.f32 %v1840_v56, %v1838_v55 }
 0x1af   :  { %v1037_v28 = vpop.f32.mrf.mxu1  ;;  %1098 = vst [vmem:[#allocation10 + $0x20] sm:$0xff] %v964_v17  ;;  %v966_v43 = vadd.f32 %v965_v20, %v1764_v33  ;;  %1203 = vadd.xlane.f32.xlu0 %v1202_v8  ;;  %v1362_v30 = vadd.f32 %v1314_v41, %v1313_v11  ;;  %v1315_v22 = vmul.f32 %v964_v17, %v964_v17 }
 0x1b0   :  { %1122 = vst [vmem:[#allocation10 + $0xe0] sm:$0xff] %v2107_v38  ;;  %v2115_v44 = vadd.f32 %v1037_v28, %v829_v14  ;;  %1206 = vadd.xlane.f32.xlu1 %v1205_v40  ;;  %v969_v23 = vpop.f32.mrf.mxu0  ;;  %v1335_v14 = vmul.f32 %v1024_v26, %v1024_v26  ;;  %v845_v55 = vadd.f32 %v1844_v59, %v1842_v58 }
 0x1b1   :  { %v1041_v25 = vpop.f32.mrf.mxu1  ;;  %1099 = vst [vmem:[#allocation10 + $0x28] sm:$0xff] %v966_v43  ;;  %v970_v47 = vadd.f32 %v969_v23, %v1766_v36  ;;  %v1172_v33 = vadd.f32 %v966_v43, %v964_v17  ;;  %v1316_v49 = vmul.f32 %v966_v43, %v966_v43  ;;  %v1337_v36 = vmul.f32 %v1030_v31, %v1030_v31 }
 0x1b2   :  { %1123 = vst [vmem:[#allocation10 + $0xe8] sm:$0xff] %v2115_v44  ;;  %v2121_v18 = vadd.f32 %v1041_v25, %v833_v27  ;;  %v971_v35 = vpop.f32.mrf.mxu0  ;;  %v1395_v53 = vadd.f32 %v1336_v46, %v1335_v14  ;;  %v847_v43 = vadd.f32 %v1848_v62, %v1846_v61  ;;  %v851_v46 = vadd.f32 %v1852_v1, %v1850_v0 }
 0x1b3   :  { %v1043_v21 = vpop.f32.mrf.mxu1  ;;  %1100 = vst [vmem:[#allocation10 + $0x30] sm:$0xff] %v970_v47  ;;  %v972_v5 = vadd.f32 %v971_v35, %v1768_v39  ;;  %1360 = vadd.xlane.f32.xlu0 %v1359_v37  ;;  %v2131_v8 = vadd.f32 %v1316_v49, %v1315_v22  ;;  %v1398_v39 = vadd.f32 %v1338_v7, %v1337_v36 }
 0x1b4   :  { %1124 = vst [vmem:[#allocation10 + $0xf0] sm:$0xff] %v2121_v18  ;;  %v2127_v50 = vadd.f32 %v1043_v21, %v835_v32  ;;  %1363 = vadd.xlane.f32.xlu1 %v1362_v30  ;;  %v975_v24 = vpop.f32.mrf.mxu0  ;;  %v1317_v31 = vmul.f32 %v970_v47, %v970_v47  ;;  %v859_v22 = vadd.f32 %v2056_v12, %v2054_v10 }
 0x1b5   :  { %v1047_v52 = vpop.f32.mrf.mxu1  ;;  %1101 = vst [vmem:[#allocation10 + $0x38] sm:$0xff] %v972_v5  ;;  %v976_v26 = vadd.f32 %v975_v24, %v1770_v42  ;;  %v1175_v17 = vadd.f32 %v972_v5, %v970_v47  ;;  %v1318_v41 = vmul.f32 %v972_v5, %v972_v5  ;;  %v1340_v36 = vmul.f32 %v2115_v44, %v2115_v44 }
 0x1b6   :  { %1125 = vst [vmem:[#allocation10 + $0xf8] sm:$0xff] %v2127_v50  ;;  %v2135_v11 = vadd.f32 %v1047_v52, %v839_v34  ;;  %v977_v40 = vpop.f32.mrf.mxu0  ;;  %v1339_v52 = vmul.f32 %v2107_v38, %v2107_v38 }
 0x1b7   :  { %v1049_v37 = vpop.f32.mrf.mxu1  ;;  %1102 = vst [vmem:[#allocation10 + $0x40] sm:$0xff] %v976_v26  ;;  %v978_v56 = vadd.f32 %v977_v40, %v1772_v45  ;;  %1396 = vadd.xlane.f32.xlu0 %v1395_v53  ;;  %v2143_v28 = vadd.f32 %v1318_v41, %v1317_v31  ;;  %v1319_v23 = vmul.f32 %v976_v26, %v976_v26 }
 0x1b8   :  { %1126 = vst [vmem:[#allocation10 + $0x100] sm:$0xff] %v2135_v11  ;;  %v2141_v27 = vadd.f32 %v1049_v37, %v841_v2  ;;  %1399 = vadd.xlane.f32.xlu1 %v1398_v39  ;;  %v981_v42 = vpop.f32.mrf.mxu0  ;;  %v1401_v37 = vadd.f32 %v1340_v36, %v1339_v52 }
 0x1b9   :  { %v1053_v20 = vpop.f32.mrf.mxu1  ;;  %1103 = vst [vmem:[#allocation10 + $0x48] sm:$0xff] %v978_v56  ;;  %v982_v58 = vadd.f32 %v981_v42, %v1774_v48  ;;  %v2151_v30 = vadd.f32 %v978_v56, %v976_v26  ;;  %v1320_v25 = vmul.f32 %v978_v56, %v978_v56  ;;  %v853_v48 = vadd.f32 %v1856_v4, %v1854_v3  ;;  %v2689_v56 = vld [vmem:[#allocation24_spill] sm:$0xff] }
 0x1ba   :  { %1127 = vst [vmem:[#allocation10 + $0x108] sm:$0xff] %v2141_v27  ;;  %v2149_v59 = vadd.f32 %v1053_v20, %v845_v55  ;;  %v983_v45 = vpop.f32.mrf.mxu0  ;;  %v857_v4 = vadd.f32 %v2052_v9, %v1858_v6  ;;  %v1211_v9 = vadd.f32 %v2127_v50, %v2121_v18  ;;  %v863_v26 = vadd.f32 %v2060_v15, %v2058_v13  ;;  %v2687_v13 = vld [vmem:[#allocation15_spill] sm:$0xff] }
 0x1bb   :  { %v1055_v32 = vpop.f32.mrf.mxu1  ;;  %1104 = vst [vmem:[#allocation10 + $0x50] sm:$0xff] %v982_v58  ;;  %v984_v61 = vadd.f32 %v983_v45, %v1776_v51  ;;  %1170 = vadd.xlane.f32.xlu0 %v2111_v29  ;;  %v2162_v34 = vadd.f32 %v1320_v25, %v1319_v23  ;;  %v1208_v51 = vadd.f32 %v2115_v44, %v2107_v38  ;;  %v2691_v23 = vld [vmem:[#allocation25_spill] sm:$0xff]  ;;  %v2692_v25 = vld [vmem:[#allocation26_spill] sm:$0xff] }
 0x1bc   :  { %1128 = vst [vmem:[#allocation10 + $0x110] sm:$0xff] %v2149_v59  ;;  %v2157_v62 = vadd.f32 %v1055_v32, %v847_v43  ;;  %1173 = vadd.xlane.f32.xlu1 %v1172_v33  ;;  %v987_v47 = vpop.f32.mrf.mxu0  ;;  %v1321_v21 = vmul.f32 %v982_v58, %v982_v58 }
 0x1bd   :  { %v1059_v7 = vpop.f32.mrf.mxu1  ;;  %1105 = vst [vmem:[#allocation10 + $0x58] sm:$0xff] %v984_v61  ;;  %v988_v0 = vadd.f32 %v987_v47, %v1778_v54  ;;  %v2170_v33 = vadd.f32 %v984_v61, %v982_v58  ;;  %v1322_v3 = vmul.f32 %v984_v61, %v984_v61  ;;  %v2690_v58 = vld [vmem:[#allocation16_spill] sm:$0xff] }
 0x1be   :  { %1129 = vst [vmem:[#allocation10 + $0x118] sm:$0xff] %v2157_v62  ;;  %v2166_v1 = vadd.f32 %v1059_v7, %v851_v46  ;;  %v989_v29 = vpop.f32.mrf.mxu0  ;;  %v871_v46 = vadd.f32 %v2692_v25, %v2691_v23  ;;  %v2693_v7 = vld [vmem:[#allocation17_spill] sm:$0xff] }
 0x1bf   :  { %v1061_v35 = vpop.f32.mrf.mxu1  ;;  %1106 = vst [vmem:[#allocation10 + $0x60] sm:$0xff] %v988_v0  ;;  %v990_v14 = vadd.f32 %v989_v29, %v1780_v57  ;;  %1209 = vadd.xlane.f32.xlu0 %v1208_v51  ;;  %v2182_v2 = vadd.f32 %v1322_v3, %v1321_v21  ;;  %v1323_v44 = vmul.f32 %v988_v0, %v988_v0  ;;  %v2705_v25 = vld [vmem:[#allocation21_spill] sm:$0xff] }
 0x1c0   :  { %1130 = vst [vmem:[#allocation10 + $0x120] sm:$0xff] %v2166_v1  ;;  %v2176_v54 = vadd.f32 %v1061_v35, %v853_v48  ;;  %1176 = vadd.xlane.f32.xlu1 %v1175_v17  ;;  %v993_v49 = vpop.f32.mrf.mxu0  ;;  %v865_v17 = vadd.f32 %v2064_v19, %v2062_v16 }
 0x1c1   :  { %v1065_v5 = vpop.f32.mrf.mxu1  ;;  %1107 = vst [vmem:[#allocation10 + $0x68] sm:$0xff] %v990_v14  ;;  %v994_v6 = vadd.f32 %v993_v49, %v1782_v60  ;;  %v2190_v24 = vadd.f32 %v990_v14, %v988_v0  ;;  %v1324_v53 = vmul.f32 %v990_v14, %v990_v14  ;;  %v2695_v14 = vld [vmem:[#allocation28_spill] sm:$0xff]  ;;  %v2696_v49 = vld [vmem:[#allocation18_spill] sm:$0xff] }
 0x1c2   :  { %1131 = vst [vmem:[#allocation10 + $0x128] sm:$0xff] %v2176_v54  ;;  %v2186_v57 = vadd.f32 %v1065_v5, %v857_v4  ;;  %v995_v10 = vpop.f32.mrf.mxu0  ;;  %v2694_v4 = vld [vmem:[#allocation27_spill] sm:$0xff] }
 0x1c3   :  { %v1067_v12 = vpop.f32.mrf.mxu1  ;;  %1108 = vst [vmem:[#allocation10 + $0x70] sm:$0xff] %v994_v6  ;;  %v996_v60 = vadd.f32 %v995_v10, %v1784_v63  ;;  %1366 = vadd.xlane.f32.xlu0 %v2131_v8  ;;  %v2203_v31 = vadd.f32 %v1324_v53, %v1323_v44  ;;  %v1342_v63 = vmul.f32 %v2127_v50, %v2127_v50  ;;  %v2688_v8 = vld [vmem:[#allocation23_spill] sm:$0xff] }
 0x1c4   :  { %1132 = vst [vmem:[#allocation10 + $0x130] sm:$0xff] %v2186_v57  ;;  %v2198_v39 = vadd.f32 %v1067_v12, %v859_v22  ;;  %1212 = vadd.xlane.f32.xlu1 %v1211_v9  ;;  %v999_v40 = vpop.f32.mrf.mxu0  ;;  %v869_v16 = vadd.f32 %v2689_v56, %v2688_v8  ;;  %v1325_v20 = vmul.f32 %v994_v6, %v994_v6  ;;  %v2698_v9 = vld [vmem:[#allocation30_spill] sm:$0xff]  ;;  %v2699_v53 = vld [vmem:[#allocation19_spill] sm:$0xff]  ;;  %v2702_v56 = vld [vmem:[#allocation20_spill] sm:$0xff] }
 0x1c5   :  { %v1071_v38 = vpop.f32.mrf.mxu1  ;;  %1109 = vst [vmem:[#allocation10 + $0x78] sm:$0xff] %v996_v60  ;;  %v1000_v15 = vadd.f32 %v999_v40, %v2687_v13  ;;  %v2211_v55 = vadd.f32 %v996_v60, %v994_v6  ;;  %v1326_v43 = vmul.f32 %v996_v60, %v996_v60  ;;  %v1341_v50 = vmul.f32 %v2121_v18, %v2121_v18  ;;  %v2697_v6 = vld [vmem:[#allocation29_spill] sm:$0xff] }
 0x1c6   :  { %1133 = vst [vmem:[#allocation10 + $0x138] sm:$0xff] %v2198_v39  ;;  %v2207_v41 = vadd.f32 %v1071_v38, %v863_v26  ;;  %v1001_v19 = vpop.f32.mrf.mxu0  ;;  %v875_v22 = vadd.f32 %v2695_v14, %v2694_v4  ;;  %v877_v10 = vadd.f32 %v2698_v9, %v2697_v6  ;;  %v1345_v6 = vmul.f32 %v2149_v59, %v2149_v59 }
 0x1c7   :  { %v1073_v42 = vpop.f32.mrf.mxu1  ;;  %1110 = vst [vmem:[#allocation10 + $0x80] sm:$0xff] %v1000_v15  ;;  %v1002_v45 = vadd.f32 %v1001_v19, %v2690_v58  ;;  %1402 = vadd.xlane.f32.xlu0 %v1401_v37  ;;  %v2224_v47 = vadd.f32 %v1326_v43, %v1325_v20  ;;  %v1404_v29 = vadd.f32 %v1342_v63, %v1341_v50  ;;  %v2701_v63 = vld [vmem:[#allocation32_spill] sm:$0xff]  ;;  %v2704_v20 = vld [vmem:[#allocation34_spill] sm:$0xff] }
 0x1c8   :  { %1134 = vst [vmem:[#allocation10 + $0x140] sm:$0xff] %v2207_v41  ;;  %v2217_v32 = vadd.f32 %v1073_v42, %v865_v17  ;;  %1369 = vadd.xlane.f32.xlu1 %v2143_v28  ;;  %v1005_v61 = vpop.f32.mrf.mxu0  ;;  %v1327_v18 = vmul.f32 %v1000_v15, %v1000_v15  ;;  %v1214_v17 = vadd.f32 %v2141_v27, %v2135_v11  ;;  %v2703_v42 = vld [vmem:[#allocation33_spill] sm:$0xff] }
 0x1c9   :  { %v1077_v48 = vpop.f32.mrf.mxu1  ;;  %1111 = vst [vmem:[#allocation10 + $0x88] sm:$0xff] %v1002_v45  ;;  %v1006_v0 = vadd.f32 %v1005_v61, %v2693_v7  ;;  %v2230_v28 = vadd.f32 %v1002_v45, %v1000_v15  ;;  %v1328_v3 = vmul.f32 %v1002_v45, %v1002_v45  ;;  %v2700_v15 = vld [vmem:[#allocation31_spill] sm:$0xff]  ;;  %v883_v43 = vadd.f32 %v2704_v20, %v2703_v42 }
 0x1ca   :  { %1135 = vst [vmem:[#allocation10 + $0x148] sm:$0xff] %v2217_v32  ;;  %v2228_v51 = vadd.f32 %v1077_v48, %v869_v16  ;;  %v1007_v35 = vpop.f32.mrf.mxu0  ;;  %v881_v8 = vadd.f32 %v2701_v63, %v2700_v15  ;;  %v1344_v50 = vmul.f32 %v2141_v27, %v2141_v27  ;;  %v2706_v27 = vld [vmem:[#allocation22_spill] sm:$0xff] }
 0x1cb   :  { %v1079_v21 = vpop.f32.mrf.mxu1  ;;  %1112 = vst [vmem:[#allocation10 + $0x90] sm:$0xff] %v1006_v0  ;;  %v1008_v5 = vadd.f32 %v1007_v35, %v2696_v49  ;;  %1179 = vadd.xlane.f32.xlu0 %v2151_v30  ;;  %v2241_v44 = vadd.f32 %v1328_v3, %v1327_v18  ;;  %v1329_v37 = vmul.f32 %v1006_v0, %v1006_v0 }
 0x1cc   :  { %1136 = vst [vmem:[#allocation10 + $0x150] sm:$0xff] %v2228_v51  ;;  %v2236_v36 = vadd.f32 %v1079_v21, %v871_v46  ;;  %1405 = vadd.xlane.f32.xlu1 %v1404_v29  ;;  %v1011_v12 = vpop.f32.mrf.mxu0  ;;  %v1343_v29 = vmul.f32 %v2135_v11, %v2135_v11 }
 0x1cd   :  { %v1083_v52 = vpop.f32.mrf.mxu1  ;;  %1113 = vst [vmem:[#allocation10 + $0x98] sm:$0xff] %v1008_v5  ;;  %v1012_v26 = vadd.f32 %v1011_v12, %v2699_v53  ;;  %v2249_v40 = vadd.f32 %v1008_v5, %v1006_v0  ;;  %v1330_v13 = vmul.f32 %v1008_v5, %v1008_v5 }
 0x1ce   :  { %1137 = vst [vmem:[#allocation10 + $0x158] sm:$0xff] %v2236_v36  ;;  %v2245_v60 = vadd.f32 %v1083_v52, %v875_v22  ;;  %v1013_v30 = vpop.f32.mrf.mxu0  ;;  %v1407_v4 = vadd.f32 %v1344_v50, %v1343_v29  ;;  %v1346_v22 = vmul.f32 %v2157_v62, %v2157_v62 }
 0x1cf   :  { %v1085_v38 = vpop.f32.mrf.mxu1  ;;  %1114 = vst [vmem:[#allocation10 + $0xa0] sm:$0xff] %v1012_v26  ;;  %v1014_v16 = vadd.f32 %v1013_v30, %v2702_v56  ;;  %1215 = vadd.xlane.f32.xlu0 %v1214_v17  ;;  %v1386_v23 = vadd.f32 %v1330_v13, %v1329_v37  ;;  %v1331_v35 = vmul.f32 %v1012_v26, %v1012_v26 }
 0x1d0   :  { %1138 = vst [vmem:[#allocation10 + $0x160] sm:$0xff] %v2245_v60  ;;  %v2255_v19 = vadd.f32 %v1085_v38, %v877_v10  ;;  %1182 = vadd.xlane.f32.xlu1 %v2170_v33  ;;  %v1017_v58 = vpop.f32.mrf.mxu0  ;;  %v1217_v33 = vadd.f32 %v2157_v62, %v2149_v59  ;;  %v1410_v10 = vadd.f32 %v1346_v22, %v1345_v6 }
 0x1d1   :  { %v1089_v45 = vpop.f32.mrf.mxu1  ;;  %1115 = vst [vmem:[#allocation10 + $0xa8] sm:$0xff] %v1014_v16  ;;  %v1018_v46 = vadd.f32 %v1017_v58, %v2705_v25  ;;  %v1196_v48 = vadd.f32 %v1014_v16, %v1012_v26  ;;  %v1332_v21 = vmul.f32 %v1014_v16, %v1014_v16  ;;  %v1223_v62 = vadd.f32 %v2198_v39, %v2186_v57 }
 0x1d2   :  { %1139 = vst [vmem:[#allocation10 + $0x168] sm:$0xff] %v2255_v19  ;;  %v2264_v61 = vadd.f32 %v1089_v45, %v881_v8  ;;  %v1019_v7 = vpop.f32.mrf.mxu0  ;;  %v1347_v59 = vmul.f32 %v2166_v1, %v2166_v1 }
 0x1d3   :  { %v1091_v0 = vpop.f32.mrf.mxu1  ;;  %1116 = vst [vmem:[#allocation10 + $0xb0] sm:$0xff] %v1018_v46  ;;  %v1020_v18 = vadd.f32 %v1019_v7, %v2706_v27  ;;  %1372 = vadd.xlane.f32.xlu0 %v2162_v34  ;;  %v1389_v14 = vadd.f32 %v1332_v21, %v1331_v35  ;;  %v1333_v11 = vmul.f32 %v1018_v46, %v1018_v46 }
 0x1d4   :  { %1140 = vst [vmem:[#allocation10 + $0x170] sm:$0xff] %v2264_v61  ;;  %v1092_v3 = vadd.f32 %v1091_v0, %v883_v43  ;;  %1218 = vadd.xlane.f32.xlu1 %v1217_v33  ;;  %v1220_v34 = vadd.f32 %v2176_v54, %v2166_v1  ;;  %v1229_v1 = vadd.f32 %v2236_v36, %v2228_v51 }
 0x1d5   :  { %1117 = vst [vmem:[#allocation10 + $0xb8] sm:$0xff] %v1020_v18  ;;  %v1199_v49 = vadd.f32 %v1020_v18, %v1018_v46  ;;  %v1334_v5 = vmul.f32 %v1020_v18, %v1020_v18  ;;  %v1357_v17 = vmul.f32 %v2264_v61, %v2264_v61 }
 0x1d6   :  { %1141 = vst [vmem:[#allocation10 + $0x178] sm:$0xff] %v1092_v3 }
 0x1d7   :  { %1408 = vadd.xlane.f32.xlu0 %v1407_v4  ;;  %v1392_v9 = vadd.f32 %v1334_v5, %v1333_v11 }
 0x1d8   :  { %1375 = vadd.xlane.f32.xlu1 %v2182_v2  ;;  %v1348_v2 = vmul.f32 %v2176_v54, %v2176_v54  ;;  %v1226_v54 = vadd.f32 %v2217_v32, %v2207_v41 }
 0x1da   :  { %v1413_v12 = vadd.f32 %v1348_v2, %v1347_v59 }
 0x1db   :  { %1185 = vadd.xlane.f32.xlu0 %v2190_v24  ;;  %v1350_v24 = vmul.f32 %v2198_v39, %v2198_v39  ;;  %v1352_v39 = vmul.f32 %v2217_v32, %v2217_v32  ;;  %v1232_v32 = vadd.f32 %v2255_v19, %v2245_v60 }
 0x1dc   :  { %1411 = vadd.xlane.f32.xlu1 %v1410_v10 }
 0x1df   :  { %1221 = vadd.xlane.f32.xlu0 %v1220_v34 }
 0x1e0   :  { %1188 = vadd.xlane.f32.xlu1 %v2211_v55  ;;  %v1349_v55 = vmul.f32 %v2186_v57, %v2186_v57  ;;  %v1351_v57 = vmul.f32 %v2207_v41, %v2207_v41  ;;  %v1356_v41 = vmul.f32 %v2255_v19, %v2255_v19 }
 0x1e2   :  { %v1416_v52 = vadd.f32 %v1350_v24, %v1349_v55 }
 0x1e3   :  { %1378 = vadd.xlane.f32.xlu0 %v2203_v31  ;;  %v1419_v31 = vadd.f32 %v1352_v39, %v1351_v57 }
 0x1e4   :  { %1224 = vadd.xlane.f32.xlu1 %v1223_v62 }
 0x1e7   :  { %1414 = vadd.xlane.f32.xlu0 %v1413_v12 }
 0x1e8   :  { %1381 = vadd.xlane.f32.xlu1 %v2224_v47  ;;  %v1354_v47 = vmul.f32 %v2236_v36, %v2236_v36  ;;  %v1355_v36 = vmul.f32 %v2245_v60, %v2245_v60 }
 0x1ea   :  { %v1425_v26 = vadd.f32 %v1356_v41, %v1355_v36 }
 0x1eb   :  { %1191 = vadd.xlane.f32.xlu0 %v2230_v28  ;;  %v1353_v28 = vmul.f32 %v2228_v51, %v2228_v51  ;;  %v1358_v51 = vmul.f32 %v1092_v3, %v1092_v3 }
 0x1ec   :  { %1417 = vadd.xlane.f32.xlu1 %v1416_v52 }
 0x1ed   :  { %v1422_v53 = vadd.f32 %v1354_v47, %v1353_v28 }
 0x1ef   :  { %1227 = vadd.xlane.f32.xlu0 %v1226_v54 }
 0x1f0   :  { %1194 = vadd.xlane.f32.xlu1 %v2249_v40  ;;  %v1428_v40 = vadd.f32 %v1358_v51, %v1357_v17 }
 0x1f3   :  { %1384 = vadd.xlane.f32.xlu0 %v2241_v44  ;;  %v1235_v44 = vadd.f32 %v1092_v3, %v2264_v61 }
 0x1f4   :  { %1230 = vadd.xlane.f32.xlu1 %v1229_v1 }
 0x1f7   :  { %1420 = vadd.xlane.f32.xlu0 %v1419_v31 }
 0x1f8   :  { %1387 = vadd.xlane.f32.xlu1 %v1386_v23 }
 0x1fb   :  { %1197 = vadd.xlane.f32.xlu0 %v1196_v48 }
 0x1fc   :  { %1423 = vadd.xlane.f32.xlu1 %v1422_v53 }
 0x1ff   :  { %1233 = vadd.xlane.f32.xlu0 %v1232_v32 }
 0x200   :  { %1200 = vadd.xlane.f32.xlu1 %v1199_v49 }
 0x203   :  { %1390 = vadd.xlane.f32.xlu0 %v1389_v14 }
 0x204   :  { %1236 = vadd.xlane.f32.xlu1 %v1235_v44 }
 0x207   :  { %1426 = vadd.xlane.f32.xlu0 %v1425_v26 }
 0x208   :  { %1393 = vadd.xlane.f32.xlu1 %v1392_v9 }
 0x20c   :  { %1429 = vadd.xlane.f32.xlu1 %v1428_v40 }
 0x20d   :  { %1671 = shalt.err (!%p1668_p10)
}
 0x20e   :  { %1490 = dma.vmem_to_hbm [thread:$0]  %s1485_s13, 6144, %s2664_s4, [#allocation4], %s1690_s26, %s1690_s26, %s1691_s27  }
 0x20f   :  { %v1142_v60 = vld [vmem:[%s2665_s5] sm:$0xff]  ;;  %v1155_v37 = vld [vmem:[%s2665_s5 + $0x68] sm:$0xff]  ;;  %v1144_v33 = vld [vmem:[%s2665_s5 + $0x10] sm:$0xff] }
 0x210   :  { %v1154_v13 = vld [vmem:[%s2665_s5 + $0x60] sm:$0xff]  ;;  %v1288_v16 = vld [vmem:[%s2666_s6 + $0x8] sm:$0xff]  ;;  %v1145_v21 = vld [vmem:[%s2665_s5 + $0x18] sm:$0xff] }
 0x211   :  { %v1287_v19 = vld [vmem:[%s2666_s6] sm:$0xff]  ;;  %v1300_v45 = vld [vmem:[%s2666_s6 + $0x68] sm:$0xff]  ;;  %v1156_v27 = vld [vmem:[%s2665_s5 + $0x70] sm:$0xff] }
 0x212   :  { %v1299_v50 = vld [vmem:[%s2666_s6 + $0x60] sm:$0xff]  ;;  %v1143_v48 = vld [vmem:[%s2665_s5 + $0x8] sm:$0xff]  ;;  %v1157_v22 = vld [vmem:[%s2665_s5 + $0x78] sm:$0xff] }
 0x213   :  { %v1289_v49 = vld [vmem:[%s2666_s6 + $0x10] sm:$0xff]  ;;  %v1290_v10 = vld [vmem:[%s2666_s6 + $0x18] sm:$0xff]  ;;  %v1146_v55 = vld [vmem:[%s2665_s5 + $0x20] sm:$0xff] }
 0x214   :  { %v1301_v34 = vld [vmem:[%s2666_s6 + $0x70] sm:$0xff]  ;;  %v1302_v24 = vld [vmem:[%s2666_s6 + $0x78] sm:$0xff]  ;;  %v1147_v57 = vld [vmem:[%s2665_s5 + $0x28] sm:$0xff] }
 0x215   :  { %v1158_v31 = vld [vmem:[%s2665_s5 + $0x80] sm:$0xff]  ;;  %v1159_v44 = vld [vmem:[%s2665_s5 + $0x88] sm:$0xff] }
 0x216   :  { %v1291_v41 = vld [vmem:[%s2666_s6 + $0x20] sm:$0xff]  ;;  %v1292_v40 = vld [vmem:[%s2666_s6 + $0x28] sm:$0xff] }
 0x234   :  { %v1168_v30 = vpop.xlane.xlu0 %1167 }
 0x235   :  { %v1238_v38 = vadd.f32 %v1168_v30, %v1142_v60  ;;  %v1303_v60 = vld [vmem:[%s2666_s6 + $0x80] sm:$0xff] }
 0x237   :  { %1263 = vst.msk [vmem:[%s2665_s5] sm:$0xff] %vm82_vm0, %v1238_v38 }
 0x238   :  { %v1204_v63 = vpop.xlane.xlu0 %1203 }
 0x239   :  { %v1207_v15 = vpop.xlane.xlu1 %1206  ;;  %v1250_v56 = vadd.f32 %v1204_v63, %v1154_v13  ;;  %v1148_v63 = vld [vmem:[%s2665_s5 + $0x30] sm:$0xff] }
 0x23a   :  { %v1251_v8 = vadd.f32 %v1207_v15, %v1155_v37  ;;  %v1304_v15 = vld [vmem:[%s2666_s6 + $0x88] sm:$0xff] }
 0x23b   :  { %1275 = vst.msk [vmem:[%s2665_s5 + $0x60] sm:$0xff] %vm82_vm0, %v1250_v56 }
 0x23c   :  { %1276 = vst.msk [vmem:[%s2665_s5 + $0x68] sm:$0xff] %vm82_vm0, %v1251_v8  ;;  %v1361_v20 = vpop.xlane.xlu0 %1360 }
 0x23d   :  { %v1364_v42 = vpop.xlane.xlu1 %1363  ;;  %v1431_v58 = vadd.f32 %v1361_v20, %v1287_v19  ;;  %v1160_v20 = vld [vmem:[%s2665_s5 + $0x90] sm:$0xff] }
 0x23e   :  { %v1432_v43 = vadd.f32 %v1364_v42, %v1288_v16  ;;  %v1149_v42 = vld [vmem:[%s2665_s5 + $0x38] sm:$0xff] }
 0x23f   :  { %1455 = vst.msk [vmem:[%s2666_s6] sm:$0xff] %vm82_vm0, %v1431_v58 }
 0x240   :  { %1456 = vst.msk [vmem:[%s2666_s6 + $0x8] sm:$0xff] %vm82_vm0, %v1432_v43  ;;  %v1397_v25 = vpop.xlane.xlu0 %1396 }
 0x241   :  { %v1400_v23 = vpop.xlane.xlu1 %1399  ;;  %v1443_v61 = vadd.f32 %v1397_v25, %v1299_v50  ;;  %v1293_v25 = vld [vmem:[%s2666_s6 + $0x30] sm:$0xff] }
 0x242   :  { %v1444_v46 = vadd.f32 %v1400_v23, %v1300_v45  ;;  %v1161_v23 = vld [vmem:[%s2665_s5 + $0x98] sm:$0xff] }
 0x243   :  { %1467 = vst.msk [vmem:[%s2666_s6 + $0x60] sm:$0xff] %vm82_vm0, %v1443_v61 }
 0x244   :  { %1468 = vst.msk [vmem:[%s2666_s6 + $0x68] sm:$0xff] %vm82_vm0, %v1444_v46  ;;  %v1171_v0 = vpop.xlane.xlu0 %1170 }
 0x245   :  { %v1174_v7 = vpop.xlane.xlu1 %1173  ;;  %v1239_v35 = vadd.f32 %v1171_v0, %v1143_v48  ;;  %v1305_v0 = vld [vmem:[%s2666_s6 + $0x90] sm:$0xff] }
 0x246   :  { %v1240_v29 = vadd.f32 %v1174_v7, %v1144_v33  ;;  %v1294_v7 = vld [vmem:[%s2666_s6 + $0x38] sm:$0xff] }
 0x247   :  { %1264 = vst.msk [vmem:[%s2665_s5 + $0x8] sm:$0xff] %vm82_vm0, %v1239_v35 }
 0x248   :  { %1265 = vst.msk [vmem:[%s2665_s5 + $0x10] sm:$0xff] %vm82_vm0, %v1240_v29  ;;  %v1210_v3 = vpop.xlane.xlu0 %1209 }
 0x249   :  { %v1177_v18 = vpop.xlane.xlu1 %1176  ;;  %v1252_v14 = vadd.f32 %v1210_v3, %v1156_v27  ;;  %v1150_v3 = vld [vmem:[%s2665_s5 + $0x40] sm:$0xff] }
 0x24a   :  { %v1241_v4 = vadd.f32 %v1177_v18, %v1145_v21  ;;  %v1306_v18 = vld [vmem:[%s2666_s6 + $0x98] sm:$0xff] }
 0x24b   :  { %1277 = vst.msk [vmem:[%s2665_s5 + $0x70] sm:$0xff] %vm82_vm0, %v1252_v14 }
 0x24c   :  { %1266 = vst.msk [vmem:[%s2665_s5 + $0x18] sm:$0xff] %vm82_vm0, %v1241_v4  ;;  %v1367_v5 = vpop.xlane.xlu0 %1366 }
 0x24d   :  { %v1213_v11 = vpop.xlane.xlu1 %1212  ;;  %v1433_v9 = vadd.f32 %v1367_v5, %v1289_v49  ;;  %v1162_v5 = vld [vmem:[%s2665_s5 + $0xa0] sm:$0xff] }
 0x24e   :  { %v1253_v6 = vadd.f32 %v1213_v11, %v1157_v22  ;;  %v1151_v11 = vld [vmem:[%s2665_s5 + $0x48] sm:$0xff] }
 0x24f   :  { %1457 = vst.msk [vmem:[%s2666_s6 + $0x10] sm:$0xff] %vm82_vm0, %v1433_v9 }
 0x250   :  { %1278 = vst.msk [vmem:[%s2665_s5 + $0x78] sm:$0xff] %vm82_vm0, %v1253_v6  ;;  %v1403_v2 = vpop.xlane.xlu0 %1402 }
 0x251   :  { %v1370_v62 = vpop.xlane.xlu1 %1369  ;;  %v1445_v12 = vadd.f32 %v1403_v2, %v1301_v34  ;;  %v1295_v2 = vld [vmem:[%s2666_s6 + $0x40] sm:$0xff] }
 0x252   :  { %v1434_v59 = vadd.f32 %v1370_v62, %v1290_v10  ;;  %v1163_v62 = vld [vmem:[%s2665_s5 + $0xa8] sm:$0xff] }
 0x253   :  { %1469 = vst.msk [vmem:[%s2666_s6 + $0x70] sm:$0xff] %vm82_vm0, %v1445_v12 }
 0x254   :  { %1458 = vst.msk [vmem:[%s2666_s6 + $0x18] sm:$0xff] %vm82_vm0, %v1434_v59  ;;  %v1180_v54 = vpop.xlane.xlu0 %1179 }
 0x255   :  { %v1406_v52 = vpop.xlane.xlu1 %1405  ;;  %v1242_v39 = vadd.f32 %v1180_v54, %v1146_v55  ;;  %v1307_v54 = vld [vmem:[%s2666_s6 + $0xa0] sm:$0xff] }
 0x256   :  { %v1446_v1 = vadd.f32 %v1406_v52, %v1302_v24  ;;  %v1296_v52 = vld [vmem:[%s2666_s6 + $0x48] sm:$0xff] }
 0x257   :  { %1267 = vst.msk [vmem:[%s2665_s5 + $0x20] sm:$0xff] %vm82_vm0, %v1242_v39 }
 0x258   :  { %1470 = vst.msk [vmem:[%s2666_s6 + $0x78] sm:$0xff] %vm82_vm0, %v1446_v1  ;;  %v1216_v28 = vpop.xlane.xlu0 %1215 }
 0x259   :  { %v1183_v47 = vpop.xlane.xlu1 %1182  ;;  %v1254_v32 = vadd.f32 %v1216_v28, %v1158_v31  ;;  %v1152_v28 = vld [vmem:[%s2665_s5 + $0x50] sm:$0xff] }
 0x25a   :  { %v1243_v53 = vadd.f32 %v1183_v47, %v1147_v57  ;;  %v1308_v47 = vld [vmem:[%s2666_s6 + $0xa8] sm:$0xff] }
 0x25b   :  { %1279 = vst.msk [vmem:[%s2665_s5 + $0x80] sm:$0xff] %vm82_vm0, %v1254_v32 }
 0x25c   :  { %1268 = vst.msk [vmem:[%s2665_s5 + $0x28] sm:$0xff] %vm82_vm0, %v1243_v53  ;;  %v1373_v26 = vpop.xlane.xlu0 %1372 }
 0x25d   :  { %v1219_v36 = vpop.xlane.xlu1 %1218  ;;  %v1435_v17 = vadd.f32 %v1373_v26, %v1291_v41  ;;  %v1164_v26 = vld [vmem:[%s2665_s5 + $0xb0] sm:$0xff] }
 0x25e   :  { %v1255_v51 = vadd.f32 %v1219_v36, %v1159_v44  ;;  %v1153_v36 = vld [vmem:[%s2665_s5 + $0x58] sm:$0xff] }
 0x25f   :  { %1459 = vst.msk [vmem:[%s2666_s6 + $0x20] sm:$0xff] %vm82_vm0, %v1435_v17 }
 0x260   :  { %1280 = vst.msk [vmem:[%s2665_s5 + $0x88] sm:$0xff] %vm82_vm0, %v1255_v51  ;;  %v1409_v38 = vpop.xlane.xlu0 %1408 }
 0x261   :  { %v1376_v30 = vpop.xlane.xlu1 %1375  ;;  %v1447_v13 = vadd.f32 %v1409_v38, %v1303_v60  ;;  %v1165_v38 = vld [vmem:[%s2665_s5 + $0xb8] sm:$0xff] }
 0x262   :  { %v1436_v37 = vadd.f32 %v1376_v30, %v1292_v40  ;;  %v1297_v30 = vld [vmem:[%s2666_s6 + $0x50] sm:$0xff] }
 0x263   :  { %1471 = vst.msk [vmem:[%s2666_s6 + $0x80] sm:$0xff] %vm82_vm0, %v1447_v13 }
 0x264   :  { %1460 = vst.msk [vmem:[%s2666_s6 + $0x28] sm:$0xff] %vm82_vm0, %v1436_v37  ;;  %v1186_v56 = vpop.xlane.xlu0 %1185 }
 0x265   :  { %v1412_v8 = vpop.xlane.xlu1 %1411  ;;  %v1244_v19 = vadd.f32 %v1186_v56, %v1148_v63  ;;  %v1298_v56 = vld [vmem:[%s2666_s6 + $0x58] sm:$0xff] }
 0x266   :  { %v1448_v16 = vadd.f32 %v1412_v8, %v1304_v15  ;;  %v1309_v8 = vld [vmem:[%s2666_s6 + $0xb0] sm:$0xff] }
 0x267   :  { %1269 = vst.msk [vmem:[%s2665_s5 + $0x30] sm:$0xff] %vm82_vm0, %v1244_v19 }
 0x268   :  { %1472 = vst.msk [vmem:[%s2666_s6 + $0x88] sm:$0xff] %vm82_vm0, %v1448_v16  ;;  %v1222_v58 = vpop.xlane.xlu0 %1221 }
 0x269   :  { %v1189_v43 = vpop.xlane.xlu1 %1188  ;;  %v1256_v50 = vadd.f32 %v1222_v58, %v1160_v20 }
 0x26a   :  { %v1245_v45 = vadd.f32 %v1189_v43, %v1149_v42  ;;  %v1310_v43 = vld [vmem:[%s2666_s6 + $0xb8] sm:$0xff] }
 0x26b   :  { %1281 = vst.msk [vmem:[%s2665_s5 + $0x90] sm:$0xff] %vm82_vm0, %v1256_v50 }
 0x26c   :  { %1270 = vst.msk [vmem:[%s2665_s5 + $0x38] sm:$0xff] %vm82_vm0, %v1245_v45  ;;  %v1379_v61 = vpop.xlane.xlu0 %1378 }
 0x26d   :  { %v1225_v46 = vpop.xlane.xlu1 %1224  ;;  %v1437_v48 = vadd.f32 %v1379_v61, %v1293_v25 }
 0x26e   :  { %v1257_v33 = vadd.f32 %v1225_v46, %v1161_v23 }
 0x26f   :  { %1461 = vst.msk [vmem:[%s2666_s6 + $0x30] sm:$0xff] %vm82_vm0, %v1437_v48 }
 0x270   :  { %1282 = vst.msk [vmem:[%s2665_s5 + $0x98] sm:$0xff] %vm82_vm0, %v1257_v33  ;;  %v1415_v35 = vpop.xlane.xlu0 %1414 }
 0x271   :  { %v1382_v29 = vpop.xlane.xlu1 %1381  ;;  %v1449_v27 = vadd.f32 %v1415_v35, %v1305_v0 }
 0x272   :  { %v1438_v21 = vadd.f32 %v1382_v29, %v1294_v7 }
 0x273   :  { %1473 = vst.msk [vmem:[%s2666_s6 + $0x90] sm:$0xff] %vm82_vm0, %v1449_v27 }
 0x274   :  { %1462 = vst.msk [vmem:[%s2666_s6 + $0x38] sm:$0xff] %vm82_vm0, %v1438_v21  ;;  %v1192_v14 = vpop.xlane.xlu0 %1191 }
 0x275   :  { %v1418_v4 = vpop.xlane.xlu1 %1417  ;;  %v1246_v49 = vadd.f32 %v1192_v14, %v1150_v3 }
 0x276   :  { %v1450_v22 = vadd.f32 %v1418_v4, %v1306_v18 }
 0x277   :  { %1271 = vst.msk [vmem:[%s2665_s5 + $0x40] sm:$0xff] %vm82_vm0, %v1246_v49 }
 0x278   :  { %1474 = vst.msk [vmem:[%s2666_s6 + $0x98] sm:$0xff] %vm82_vm0, %v1450_v22  ;;  %v1228_v9 = vpop.xlane.xlu0 %1227 }
 0x279   :  { %v1195_v6 = vpop.xlane.xlu1 %1194  ;;  %v1258_v34 = vadd.f32 %v1228_v9, %v1162_v5 }
 0x27a   :  { %v1247_v10 = vadd.f32 %v1195_v6, %v1151_v11 }
 0x27b   :  { %1283 = vst.msk [vmem:[%s2665_s5 + $0xa0] sm:$0xff] %vm82_vm0, %v1258_v34 }
 0x27c   :  { %1272 = vst.msk [vmem:[%s2665_s5 + $0x48] sm:$0xff] %vm82_vm0, %v1247_v10  ;;  %v1385_v12 = vpop.xlane.xlu0 %1384 }
 0x27d   :  { %v1231_v59 = vpop.xlane.xlu1 %1230  ;;  %v1439_v55 = vadd.f32 %v1385_v12, %v1295_v2 }
 0x27e   :  { %v1259_v24 = vadd.f32 %v1231_v59, %v1163_v62 }
 0x27f   :  { %1463 = vst.msk [vmem:[%s2666_s6 + $0x40] sm:$0xff] %vm82_vm0, %v1439_v55 }
 0x280   :  { %1284 = vst.msk [vmem:[%s2665_s5 + $0xa8] sm:$0xff] %vm82_vm0, %v1259_v24  ;;  %v1421_v39 = vpop.xlane.xlu0 %1420 }
 0x281   :  { %v1388_v1 = vpop.xlane.xlu1 %1387  ;;  %v1451_v31 = vadd.f32 %v1421_v39, %v1307_v54 }
 0x282   :  { %v1440_v57 = vadd.f32 %v1388_v1, %v1296_v52 }
 0x283   :  { %1475 = vst.msk [vmem:[%s2666_s6 + $0xa0] sm:$0xff] %vm82_vm0, %v1451_v31 }
 0x284   :  { %1464 = vst.msk [vmem:[%s2666_s6 + $0x48] sm:$0xff] %vm82_vm0, %v1440_v57  ;;  %v1198_v32 = vpop.xlane.xlu0 %1197 }
 0x285   :  { %v1424_v53 = vpop.xlane.xlu1 %1423  ;;  %v1248_v41 = vadd.f32 %v1198_v32, %v1152_v28 }
 0x286   :  { %v1452_v44 = vadd.f32 %v1424_v53, %v1308_v47 }
 0x287   :  { %1273 = vst.msk [vmem:[%s2665_s5 + $0x50] sm:$0xff] %vm82_vm0, %v1248_v41 }
 0x288   :  { %1476 = vst.msk [vmem:[%s2666_s6 + $0xa8] sm:$0xff] %vm82_vm0, %v1452_v44  ;;  %v1234_v17 = vpop.xlane.xlu0 %1233 }
 0x289   :  { %v1201_v51 = vpop.xlane.xlu1 %1200  ;;  %v1260_v60 = vadd.f32 %v1234_v17, %v1164_v26 }
 0x28a   :  { %v1249_v40 = vadd.f32 %v1201_v51, %v1153_v36 }
 0x28b   :  { %1285 = vst.msk [vmem:[%s2665_s5 + $0xb0] sm:$0xff] %vm82_vm0, %v1260_v60 }
 0x28c   :  { %1274 = vst.msk [vmem:[%s2665_s5 + $0x58] sm:$0xff] %vm82_vm0, %v1249_v40  ;;  %v1391_v37 = vpop.xlane.xlu0 %1390 }
 0x28d   :  { %v1237_v13 = vpop.xlane.xlu1 %1236  ;;  %v1441_v15 = vadd.f32 %v1391_v37, %v1297_v30 }
 0x28e   :  { %v1261_v63 = vadd.f32 %v1237_v13, %v1165_v38 }
 0x28f   :  { %1465 = vst.msk [vmem:[%s2666_s6 + $0x50] sm:$0xff] %vm82_vm0, %v1441_v15 }
 0x290   :  { %1286 = vst.msk [vmem:[%s2665_s5 + $0xb8] sm:$0xff] %vm82_vm0, %v1261_v63  ;;  %v1427_v16 = vpop.xlane.xlu0 %1426 }
 0x291   :  { %v1394_v19 = vpop.xlane.xlu1 %1393  ;;  %v1453_v42 = vadd.f32 %v1427_v16, %v1309_v8 }
 0x292   :  { %v1442_v20 = vadd.f32 %v1394_v19, %v1298_v56 }
 0x293   :  { %1477 = vst.msk [vmem:[%s2666_s6 + $0xb0] sm:$0xff] %vm82_vm0, %v1453_v42 }
 0x294   :  { %1466 = vst.msk [vmem:[%s2666_s6 + $0x58] sm:$0xff] %vm82_vm0, %v1442_v20 }
 0x295   :  { %v1430_v58 = vpop.xlane.xlu1 %1429 }
 0x296   :  { %v1454_v45 = vadd.f32 %v1430_v58, %v1310_v43 }
 0x298   :  { %1478 = vst.msk [vmem:[%s2666_s6 + $0xb8] sm:$0xff] %vm82_vm0, %v1454_v45 }
 0x299   :  { %1686 = dma.done.wait [#allocation4], 6144  }
 0x29a   :  { %1687 = vsyncadd [#allocation4], 4294961152 }
 0x29b   :  { %1502 = vsyncpa [#allocation3], 1 }
 0x29c   :  { %1503 = vsyncpa [#allocation6], 1 }
 0x29d   :  { %1504 = vsyncpa [#allocation9], 1 }
 0x29e   :  { %1505 = vsyncpa [#allocation4], 1 }

</bundles_post_ra>
